<compile_context>
chip_gen: v6e
topology: v6e:2x2x1
jax: 0.10.0
libtpu: 0.0.40
codegen_flags: <defaults>
</compile_context>

<pallas_src>
import functools
import math

import jax
import jax.numpy as jnp
from jax.experimental import pallas as pl
from jax.experimental.pallas import tpu as pltpu  # noqa: F401  (TPU backend context)


# ----------------------------------------------------------------------------
# Model constants
# ----------------------------------------------------------------------------
PATCH = 4
D_MODEL = 32
D_FFN = 64
NUM_QUERIES = 8
NUM_CLASSES = 3
VOCAB = 64
SEQ_LEN = 8
IMG = 32
HP = IMG // PATCH          # 8   (patch grid side)
HW0 = HP * HP              # 64  (finest scale tokens per image)
HW1 = (HP // 2) ** 2       # 16
HW2 = (HP // 4) ** 2       # 4
PATCH_DIM = PATCH * PATCH * 3   # 48


def make_pool_matrix(h, w):
    """Constant (h//2 * w//2, h*w) matrix implementing 2x2 average pooling as a matmul."""
    r = jnp.arange(h * w) // w
    c = jnp.arange(h * w) % w
    dst = (r // 2) * (w // 2) + (c // 2)
    return (jnp.arange((h // 2) * (w // 2))[:, None] == dst[None, :]).astype(jnp.float32) * 0.25


# ----------------------------------------------------------------------------
# Single fused kernel: image encoder + pixel decoder + text proj + mask decoder
# ----------------------------------------------------------------------------
def _m_fused_kernel(
        # per-batch data
        patches_ref, tok_ref, eot_ref, lmask_ref,
        # image encoder / pixel decoder weights
        patch_w_ref, patch_b_ref,
        lvl0_w_ref, lvl0_b_ref, maskfeat_w_ref, maskfeat_b_ref,
        pool1_ref, lvl1_w_ref, lvl1_b_ref,
        pool2_ref, lvl2_w_ref, lvl2_b_ref,
        # text
        text_enc_w_ref, text_enc_b_ref, text_proj_w_ref, text_proj_b_ref,
        # mask decoder
        query_feat_ref, ffn1_w_ref, ffn1_b_ref, ffn2_w_ref, ffn2_b_ref,
        cls_w_ref, cls_b_ref, maskemb_w_ref, maskemb_b_ref,
        # outputs
        logits_ref, masks_ref, ms1_ref, ms2_ref,
        *, scale, batch):
    f32 = jnp.float32
    bf16 = jnp.bfloat16

    # ---------------- image encoder: patch embed, batch folded into rows -----
    feat = jnp.dot(patches_ref[...], patch_w_ref[...],
                   preferred_element_type=f32) + patch_b_ref[...]      # (B*HW0, D)
    feat_b = feat.astype(bf16)

    # ---------------- pixel decoder ------------------------------------------
    # lvl0 tokens and mask features: two 1x1 convs on the finest scale
    img2d = jnp.dot(feat_b, lvl0_w_ref[...],
                    preferred_element_type=f32) + lvl0_b_ref[...]       # (B*HW0, D)
    mf2d = jnp.dot(feat_b, maskfeat_w_ref[...],
                   preferred_element_type=f32) + maskfeat_b_ref[...]    # (B*HW0, D)
    img_tok = img2d.reshape(batch, HW0, D_MODEL).astype(bf16)           # (B, HW0, D)
    mask_feat = mf2d.reshape(batch, HW0, D_MODEL).astype(bf16)          # (B, HW0, D)

    # 2x2 average pooling as block-diagonal matmuls (stays on the MXU)
    f1 = jnp.dot(pool1_ref[...], feat_b, preferred_element_type=f32)    # (B*HW1, D)
    ms1 = jnp.dot(f1.astype(bf16), lvl1_w_ref[...],
                  preferred_element_type=f32) + lvl1_b_ref[...]
    ms1_ref[...] = ms1.astype(ms1_ref.dtype)

    f2 = jnp.dot(pool2_ref[...], f1.astype(bf16),
                 preferred_element_type=f32)                            # (B*HW2, D)
    ms2 = jnp.dot(f2.astype(bf16), lvl2_w_ref[...],
                  preferred_element_type=f32) + lvl2_b_ref[...]
    ms2_ref[...] = ms2.astype(ms2_ref.dtype)

    # ---------------- synthetic CLIP text encoder -----------------------------
    l_enc = jnp.einsum('bld,de->ble', tok_ref[...], text_enc_w_ref[...],
                       preferred_element_type=f32) + text_enc_b_ref[...]   # (B, L, D)
    l_enc_b = l_enc.astype(bf16)
    pooled = jnp.einsum('bol,bld->bod', eot_ref[...], l_enc_b,
                        preferred_element_type=f32)                        # (B, 1, D)
    l_embed = jnp.einsum('bod,de->boe', pooled.astype(bf16), text_proj_w_ref[...],
                         preferred_element_type=f32) + text_proj_b_ref[...]  # (B, 1, D)

    # queries conditioned on the sentence embedding
    q = query_feat_ref[...] + l_embed                                      # (B, Q, D) f32

    def softmax(s):
        m = jnp.max(s, axis=-1, keepdims=True)
        e = jnp.exp(s - m)
        return e * pl.reciprocal(jnp.sum(e, axis=-1, keepdims=True), approx=True)

    def cross_attn(q_f32, kv_b, key_mask=None):
        s = jnp.einsum('bqd,bkd->bqk', q_f32.astype(bf16), kv_b,
                       preferred_element_type=f32) * scale                 # (B, Q, K)
        if key_mask is not None:
            s = jnp.where(key_mask > 0.5, -1e9, s)
        p = softmax(s)
        return jnp.einsum('bqk,bkd->bqd', p.astype(bf16), kv_b,
                          preferred_element_type=f32)                      # (B, Q, D)

    # 1) masked cross-attention over text tokens (residual fused)
    q = q + cross_attn(q, l_enc_b, lmask_ref[...])
    # 2) cross-attention over the finest image scale (residual fused)
    q = q + cross_attn(q, img_tok)
    # 3) FFN (residual fused, ReLU in f32)
    h = jnp.einsum('bqd,df->bqf', q.astype(bf16), ffn1_w_ref[...],
                   preferred_element_type=f32) + ffn1_b_ref[...]
    h = jnp.maximum(h, 0.0)
    q = q + jnp.einsum('bqf,fd->bqd', h.astype(bf16), ffn2_w_ref[...],
                       preferred_element_type=f32) + ffn2_b_ref[...]

    # 4) prediction heads
    q_b = q.astype(bf16)
    logits = jnp.einsum('bqd,de->bqe', q_b, cls_w_ref[...],
                        preferred_element_type=f32) + cls_b_ref[...]       # (B, Q, C+1)
    logits_ref[...] = logits.astype(logits_ref.dtype)

    mask_embed = (jnp.einsum('bqd,de->bqe', q_b, maskemb_w_ref[...],
                             preferred_element_type=f32)
                  + maskemb_b_ref[...]).astype(bf16)                       # (B, Q, D)

    # 5) mask prediction einsum against the mask features
    masks_ref[...] = jnp.einsum('bqd,bkd->bqk', mask_embed, mask_feat,
                                preferred_element_type=f32).astype(masks_ref.dtype)


# ----------------------------------------------------------------------------
# Parameters (matmul weights in bf16, biases / embeddings in f32)
# ----------------------------------------------------------------------------
def init_params(key):
    keys = jax.random.split(key, 16)
    s = 0.02

    def w(k, shape, dtype=jnp.bfloat16):
        return (jax.random.normal(k, shape, jnp.float32) * s).astype(dtype)

    def b(n):
        return jnp.zeros((1, n), jnp.float32)

    return {
        # image encoder (frozen backbone, inference only): patch embed
        "patch_w": w(keys[0], (PATCH_DIM, D_MODEL)), "patch_b": b(D_MODEL),
        # pixel decoder: lvl0-token conv + mask-feature conv + coarser levels
        "lvl0_w": w(keys[1], (D_MODEL, D_MODEL)), "lvl0_b": b(D_MODEL),
        "maskfeat_w": w(keys[4], (D_MODEL, D_MODEL)), "maskfeat_b": b(D_MODEL),
        "lvl1_w": w(keys[2], (D_MODEL, D_MODEL)), "lvl1_b": b(D_MODEL),
        "lvl2_w": w(keys[3], (D_MODEL, D_MODEL)), "lvl2_b": b(D_MODEL),
        # per-image constant pooling matrices (2x2 avg pool as MXU matmul)
        "pool1": make_pool_matrix(HP, HP),              # (HW1, HW0) f32
        "pool2": make_pool_matrix(HP // 2, HP // 2),    # (HW2, HW1) f32
        # text encoder
        "tok_embed": w(keys[5], (VOCAB, D_MODEL), jnp.float32),
        "pos_embed": w(keys[6], (SEQ_LEN, D_MODEL), jnp.float32),
        "text_enc_w": w(keys[7], (D_MODEL, D_MODEL)), "text_enc_b": b(D_MODEL),
        "text_proj_w": w(keys[8], (D_MODEL, D_MODEL)), "text_proj_b": b(D_MODEL),
        # mask decoder
        "query_feat": w(keys[9], (NUM_QUERIES, D_MODEL), jnp.float32),
        "ffn1_w": w(keys[10], (D_MODEL, D_FFN)), "ffn1_b": b(D_FFN),
        "ffn2_w": w(keys[11], (D_FFN, D_MODEL)), "ffn2_b": b(D_MODEL),
        "cls_w": w(keys[12], (D_MODEL, NUM_CLASSES + 1)), "cls_b": b(NUM_CLASSES + 1),
        "maskemb_w": w(keys[13], (D_MODEL, D_MODEL)), "maskemb_b": b(D_MODEL),
    }


# ----------------------------------------------------------------------------
# Forward (mirrors M.forward: image_encoder -> pixel_decoder -> clip -> decoder)
# ----------------------------------------------------------------------------
def m_forward(params, batched_images, batched_sents):
    p = params
    B = batched_images.shape[0]

    # ---- host-side XLA glue: im2col patch extraction (NCHW -> flat patch tokens)
    x = jnp.transpose(batched_images, (0, 2, 3, 1)).astype(jnp.float32)   # NCHW -> NHWC
    patches = x.reshape(B, HP, PATCH, HP, PATCH, 3)
    patches = patches.transpose(0, 1, 3, 2, 4, 5).reshape(B * HW0, PATCH_DIM)
    patches = patches.astype(jnp.bfloat16)

    # ---- host-side XLA glue: token embedding gather + EOT one-hot + pad mask
    sents = jnp.squeeze(batched_sents, axis=1)                             # (B, L)
    tok = (jnp.take(p["tok_embed"], sents, axis=0)
           + p["pos_embed"][None, :, :]).astype(jnp.bfloat16)              # (B, L, D)
    eot_idx = jnp.argmax(sents, axis=-1)       # synthetic pooled-token choice (not CLIP-exact)
    eot_onehot = jax.nn.one_hot(eot_idx, SEQ_LEN, dtype=jnp.bfloat16)[:, None, :]  # (B, 1, L)
    text_mask = (sents == 0).astype(jnp.float32)[:, None, :]               # (B, 1, L)

    # batch-folded block-diagonal pooling matrices (2x2 avg pool as one MXU matmul)
    eye = jnp.eye(B, dtype=jnp.float32)
    pool1_blk = jnp.kron(eye, p["pool1"]).astype(jnp.bfloat16)             # (B*HW1, B*HW0)
    pool2_blk = jnp.kron(eye, p["pool2"]).astype(jnp.bfloat16)             # (B*HW2, B*HW1)

    kernel = functools.partial(_m_fused_kernel,
                               scale=1.0 / math.sqrt(D_MODEL), batch=B)

    logits, masks, _ms1, _ms2 = pl.pallas_call(
        kernel,
        out_shape=(
            jax.ShapeDtypeStruct((B, NUM_QUERIES, NUM_CLASSES + 1), jnp.float32),
            jax.ShapeDtypeStruct((B, NUM_QUERIES, HW0), jnp.float32),
            jax.ShapeDtypeStruct((B * HW1, D_MODEL), jnp.float32),
            jax.ShapeDtypeStruct((B * HW2, D_MODEL), jnp.float32),
        ),
    )(
        patches, tok, eot_onehot, text_mask,
        p["patch_w"], p["patch_b"],
        p["lvl0_w"], p["lvl0_b"], p["maskfeat_w"], p["maskfeat_b"],
        pool1_blk, p["lvl1_w"], p["lvl1_b"],
        pool2_blk, p["lvl2_w"], p["lvl2_b"],
        p["text_enc_w"], p["text_enc_b"].reshape(1, 1, D_MODEL),
        p["text_proj_w"], p["text_proj_b"].reshape(1, 1, D_MODEL),
        p["query_feat"].reshape(1, NUM_QUERIES, D_MODEL),
        p["ffn1_w"], p["ffn1_b"].reshape(1, 1, D_FFN),
        p["ffn2_w"], p["ffn2_b"].reshape(1, 1, D_MODEL),
        p["cls_w"], p["cls_b"].reshape(1, 1, NUM_CLASSES + 1),
        p["maskemb_w"], p["maskemb_b"].reshape(1, 1, D_MODEL),
    )

    return {"pred_logits": logits,
            "pred_masks": masks.reshape(B, NUM_QUERIES, HP, HP)}


# ----------------------------------------------------------------------------
if __name__ == "__main__":
    key = jax.random.PRNGKey(0)
    kp, ki, ks = jax.random.split(key, 3)

    params = init_params(kp)

    B = 2
    batched_images = jax.random.normal(ki, (B, 3, IMG, IMG), jnp.float32)   # NCHW like PyTorch
    toks = jax.random.randint(ks, (B, 1, SEQ_LEN), 1, VOCAB, jnp.int32)
    # zero-out the tail to create padding (l_masks)
    pad = jnp.arange(SEQ_LEN)[None, None, :] >= jnp.array([5, 6])[:, None, None]
    batched_sents = jnp.where(pad, 0, toks)

    fwd = jax.jit(m_forward)
    out = fwd(params, batched_images, batched_sents)
    jax.block_until_ready(out)

    assert out["pred_logits"].shape == (B, NUM_QUERIES, NUM_CLASSES + 1)
    assert out["pred_masks"].shape == (B, NUM_QUERIES, HP, HP)
    print("KERNEL_OK")
</pallas_src>

<mosaic_0001>
module attributes {stable_mosaic.version = 11 : i64} {
  func.func @_m_fused_kernel(%arg0: memref<128x48xbf16, #tpu.memory_space<vmem>>, %arg1: memref<2x8x32xbf16, #tpu.memory_space<vmem>>, %arg2: memref<2x1x8xbf16, #tpu.memory_space<vmem>>, %arg3: memref<2x1x8xf32, #tpu.memory_space<vmem>>, %arg4: memref<48x32xbf16, #tpu.memory_space<vmem>>, %arg5: memref<1x32xf32, #tpu.memory_space<vmem>>, %arg6: memref<32x32xbf16, #tpu.memory_space<vmem>>, %arg7: memref<1x32xf32, #tpu.memory_space<vmem>>, %arg8: memref<32x32xbf16, #tpu.memory_space<vmem>>, %arg9: memref<1x32xf32, #tpu.memory_space<vmem>>, %arg10: memref<32x128xbf16, #tpu.memory_space<vmem>>, %arg11: memref<32x32xbf16, #tpu.memory_space<vmem>>, %arg12: memref<1x32xf32, #tpu.memory_space<vmem>>, %arg13: memref<8x32xbf16, #tpu.memory_space<vmem>>, %arg14: memref<32x32xbf16, #tpu.memory_space<vmem>>, %arg15: memref<1x32xf32, #tpu.memory_space<vmem>>, %arg16: memref<32x32xbf16, #tpu.memory_space<vmem>>, %arg17: memref<1x1x32xf32, #tpu.memory_space<vmem>>, %arg18: memref<32x32xbf16, #tpu.memory_space<vmem>>, %arg19: memref<1x1x32xf32, #tpu.memory_space<vmem>>, %arg20: memref<1x8x32xf32, #tpu.memory_space<vmem>>, %arg21: memref<32x64xbf16, #tpu.memory_space<vmem>>, %arg22: memref<1x1x64xf32, #tpu.memory_space<vmem>>, %arg23: memref<64x32xbf16, #tpu.memory_space<vmem>>, %arg24: memref<1x1x32xf32, #tpu.memory_space<vmem>>, %arg25: memref<32x4xbf16, #tpu.memory_space<vmem>>, %arg26: memref<1x1x4xf32, #tpu.memory_space<vmem>>, %arg27: memref<32x32xbf16, #tpu.memory_space<vmem>>, %arg28: memref<1x1x32xf32, #tpu.memory_space<vmem>>, %arg29: memref<2x8x4xf32, #tpu.memory_space<vmem>>, %arg30: memref<2x8x64xf32, #tpu.memory_space<vmem>>, %arg31: memref<32x32xf32, #tpu.memory_space<vmem>>, %arg32: memref<8x32xf32, #tpu.memory_space<vmem>>) attributes {dimension_semantics = [], scalar_prefetch = 0 : i64, scratch_operands = 0 : i64, tpu.core_type = #tpu.core_type<tc>} {
    %c0 = arith.constant 0 : index
    %c0_0 = arith.constant 0 : index
    %0 = vector.load %arg0[%c0, %c0_0] : memref<128x48xbf16, #tpu.memory_space<vmem>>, vector<128x48xbf16>
    %c0_1 = arith.constant 0 : index
    %c0_2 = arith.constant 0 : index
    %1 = vector.load %arg4[%c0_1, %c0_2] : memref<48x32xbf16, #tpu.memory_space<vmem>>, vector<48x32xbf16>
    %cst = arith.constant dense<0.000000e+00> : vector<128x32xf32>
    %2 = tpu.matmul %0, %1, %cst {dimension_numbers = #tpu.dot_dimension_numbers<[1], [0], [0], [1], [0, 0, 1, 1], [], []>} : vector<128x48xbf16>, vector<48x32xbf16>, vector<128x32xf32> -> vector<128x32xf32>
    %c0_3 = arith.constant 0 : index
    %c0_4 = arith.constant 0 : index
    %3 = vector.load %arg5[%c0_3, %c0_4] : memref<1x32xf32, #tpu.memory_space<vmem>>, vector<1x32xf32>
    %4 = vector.broadcast %3 : vector<1x32xf32> to vector<128x32xf32>
    %5 = arith.addf %2, %4 : vector<128x32xf32>
    %6 = arith.truncf %5 : vector<128x32xf32> to vector<128x32xbf16>
    %c0_5 = arith.constant 0 : index
    %c0_6 = arith.constant 0 : index
    %7 = vector.load %arg6[%c0_5, %c0_6] : memref<32x32xbf16, #tpu.memory_space<vmem>>, vector<32x32xbf16>
    %cst_7 = arith.constant dense<0.000000e+00> : vector<128x32xf32>
    %8 = tpu.matmul %6, %7, %cst_7 {dimension_numbers = #tpu.dot_dimension_numbers<[1], [0], [0], [1], [0, 0, 1, 1], [], []>} : vector<128x32xbf16>, vector<32x32xbf16>, vector<128x32xf32> -> vector<128x32xf32>
    %c0_8 = arith.constant 0 : index
    %c0_9 = arith.constant 0 : index
    %9 = vector.load %arg7[%c0_8, %c0_9] : memref<1x32xf32, #tpu.memory_space<vmem>>, vector<1x32xf32>
    %10 = vector.broadcast %9 : vector<1x32xf32> to vector<128x32xf32>
    %11 = arith.addf %8, %10 : vector<128x32xf32>
    %c0_10 = arith.constant 0 : index
    %c0_11 = arith.constant 0 : index
    %12 = vector.load %arg8[%c0_10, %c0_11] : memref<32x32xbf16, #tpu.memory_space<vmem>>, vector<32x32xbf16>
    %cst_12 = arith.constant dense<0.000000e+00> : vector<128x32xf32>
    %13 = tpu.matmul %6, %12, %cst_12 {dimension_numbers = #tpu.dot_dimension_numbers<[1], [0], [0], [1], [0, 0, 1, 1], [], []>} : vector<128x32xbf16>, vector<32x32xbf16>, vector<128x32xf32> -> vector<128x32xf32>
    %c0_13 = arith.constant 0 : index
    %c0_14 = arith.constant 0 : index
    %14 = vector.load %arg9[%c0_13, %c0_14] : memref<1x32xf32, #tpu.memory_space<vmem>>, vector<1x32xf32>
    %15 = vector.broadcast %14 : vector<1x32xf32> to vector<128x32xf32>
    %16 = arith.addf %13, %15 : vector<128x32xf32>
    %17 = vector.shape_cast %11 : vector<128x32xf32> to vector<2x64x32xf32>
    %18 = arith.truncf %17 : vector<2x64x32xf32> to vector<2x64x32xbf16>
    %19 = vector.shape_cast %16 : vector<128x32xf32> to vector<2x64x32xf32>
    %20 = arith.truncf %19 : vector<2x64x32xf32> to vector<2x64x32xbf16>
    %c0_15 = arith.constant 0 : index
    %c0_16 = arith.constant 0 : index
    %21 = vector.load %arg10[%c0_15, %c0_16] : memref<32x128xbf16, #tpu.memory_space<vmem>>, vector<32x128xbf16>
    %cst_17 = arith.constant dense<0.000000e+00> : vector<32x32xf32>
    %22 = tpu.matmul %21, %6, %cst_17 {dimension_numbers = #tpu.dot_dimension_numbers<[1], [0], [0], [1], [0, 0, 1, 1], [], []>} : vector<32x128xbf16>, vector<128x32xbf16>, vector<32x32xf32> -> vector<32x32xf32>
    %23 = arith.truncf %22 : vector<32x32xf32> to vector<32x32xbf16>
    %c0_18 = arith.constant 0 : index
    %c0_19 = arith.constant 0 : index
    %24 = vector.load %arg11[%c0_18, %c0_19] : memref<32x32xbf16, #tpu.memory_space<vmem>>, vector<32x32xbf16>
    %cst_20 = arith.constant dense<0.000000e+00> : vector<32x32xf32>
    %25 = tpu.matmul %23, %24, %cst_20 {dimension_numbers = #tpu.dot_dimension_numbers<[1], [0], [0], [1], [0, 0, 1, 1], [], []>} : vector<32x32xbf16>, vector<32x32xbf16>, vector<32x32xf32> -> vector<32x32xf32>
    %c0_21 = arith.constant 0 : index
    %c0_22 = arith.constant 0 : index
    %26 = vector.load %arg12[%c0_21, %c0_22] : memref<1x32xf32, #tpu.memory_space<vmem>>, vector<1x32xf32>
    %27 = vector.broadcast %26 : vector<1x32xf32> to vector<32x32xf32>
    %28 = arith.addf %25, %27 : vector<32x32xf32>
    %c0_23 = arith.constant 0 : index
    %c0_24 = arith.constant 0 : index
    %29 = vector.load %arg31[%c0_23, %c0_24] : memref<32x32xf32, #tpu.memory_space<vmem>>, vector<32x32xf32>
    tpu.vector_store %arg31[%c0_23, %c0_24], %28 {strides = array<i32>} : memref<32x32xf32, #tpu.memory_space<vmem>>, vector<32x32xf32>,
    %c0_25 = arith.constant 0 : index
    %c0_26 = arith.constant 0 : index
    %30 = vector.load %arg13[%c0_25, %c0_26] : memref<8x32xbf16, #tpu.memory_space<vmem>>, vector<8x32xbf16>
    %31 = arith.truncf %22 : vector<32x32xf32> to vector<32x32xbf16>
    %cst_27 = arith.constant dense<0.000000e+00> : vector<8x32xf32>
    %32 = tpu.matmul %30, %31, %cst_27 {dimension_numbers = #tpu.dot_dimension_numbers<[1], [0], [0], [1], [0, 0, 1, 1], [], []>} : vector<8x32xbf16>, vector<32x32xbf16>, vector<8x32xf32> -> vector<8x32xf32>
    %33 = arith.truncf %32 : vector<8x32xf32> to vector<8x32xbf16>
    %c0_28 = arith.constant 0 : index
    %c0_29 = arith.constant 0 : index
    %34 = vector.load %arg14[%c0_28, %c0_29] : memref<32x32xbf16, #tpu.memory_space<vmem>>, vector<32x32xbf16>
    %cst_30 = arith.constant dense<0.000000e+00> : vector<8x32xf32>
    %35 = tpu.matmul %33, %34, %cst_30 {dimension_numbers = #tpu.dot_dimension_numbers<[1], [0], [0], [1], [0, 0, 1, 1], [], []>} : vector<8x32xbf16>, vector<32x32xbf16>, vector<8x32xf32> -> vector<8x32xf32>
    %c0_31 = arith.constant 0 : index
    %c0_32 = arith.constant 0 : index
    %36 = vector.load %arg15[%c0_31, %c0_32] : memref<1x32xf32, #tpu.memory_space<vmem>>, vector<1x32xf32>
    %37 = vector.broadcast %36 : vector<1x32xf32> to vector<8x32xf32>
    %38 = arith.addf %35, %37 : vector<8x32xf32>
    %c0_33 = arith.constant 0 : index
    %c0_34 = arith.constant 0 : index
    %39 = vector.load %arg32[%c0_33, %c0_34] : memref<8x32xf32, #tpu.memory_space<vmem>>, vector<8x32xf32>
    tpu.vector_store %arg32[%c0_33, %c0_34], %38 {strides = array<i32>} : memref<8x32xf32, #tpu.memory_space<vmem>>, vector<8x32xf32>,
    %c0_35 = arith.constant 0 : index
    %c0_36 = arith.constant 0 : index
    %c0_37 = arith.constant 0 : index
    %40 = vector.load %arg1[%c0_35, %c0_36, %c0_37] : memref<2x8x32xbf16, #tpu.memory_space<vmem>>, vector<2x8x32xbf16>
    %c0_38 = arith.constant 0 : index
    %c0_39 = arith.constant 0 : index
    %41 = vector.load %arg16[%c0_38, %c0_39] : memref<32x32xbf16, #tpu.memory_space<vmem>>, vector<32x32xbf16>
    "tpu.trace_start"() <{level = 10 : i32, message = "bld,de->ble"}> : () -> ()
    %cst_40 = arith.constant dense<0.000000e+00> : vector<2x8x32xf32>
    %42 = tpu.matmul %40, %41, %cst_40 {dimension_numbers = #tpu.dot_dimension_numbers<[2], [0], [0, 1], [1], [0, 0, 0, 1, 1, 1], [], []>} : vector<2x8x32xbf16>, vector<32x32xbf16>, vector<2x8x32xf32> -> vector<2x8x32xf32>
    "tpu.trace_stop"() : () -> ()
    %c0_41 = arith.constant 0 : index
    %c0_42 = arith.constant 0 : index
    %c0_43 = arith.constant 0 : index
    %43 = vector.load %arg17[%c0_41, %c0_42, %c0_43] : memref<1x1x32xf32, #tpu.memory_space<vmem>>, vector<1x1x32xf32>
    %44 = vector.broadcast %43 : vector<1x1x32xf32> to vector<2x8x32xf32>
    %45 = arith.addf %42, %44 : vector<2x8x32xf32>
    %46 = arith.truncf %45 : vector<2x8x32xf32> to vector<2x8x32xbf16>
    %c0_44 = arith.constant 0 : index
    %c0_45 = arith.constant 0 : index
    %c0_46 = arith.constant 0 : index
    %47 = vector.load %arg2[%c0_44, %c0_45, %c0_46] : memref<2x1x8xbf16, #tpu.memory_space<vmem>>, vector<2x1x8xbf16>
    "tpu.trace_start"() <{level = 10 : i32, message = "bol,bld->bod"}> : () -> ()
    %cst_47 = arith.constant dense<0.000000e+00> : vector<2x1x32xf32>
    %48 = tpu.matmul %47, %46, %cst_47 {dimension_numbers = #tpu.dot_dimension_numbers<[2], [1], [1], [2], [0, 0, 0, 1, 1, 2], [0], [0]>} : vector<2x1x8xbf16>, vector<2x8x32xbf16>, vector<2x1x32xf32> -> vector<2x1x32xf32>
    "tpu.trace_stop"() : () -> ()
    %49 = arith.truncf %48 : vector<2x1x32xf32> to vector<2x1x32xbf16>
    %c0_48 = arith.constant 0 : index
    %c0_49 = arith.constant 0 : index
    %50 = vector.load %arg18[%c0_48, %c0_49] : memref<32x32xbf16, #tpu.memory_space<vmem>>, vector<32x32xbf16>
    "tpu.trace_start"() <{level = 10 : i32, message = "bod,de->boe"}> : () -> ()
    %cst_50 = arith.constant dense<0.000000e+00> : vector<2x1x32xf32>
    %51 = tpu.matmul %49, %50, %cst_50 {dimension_numbers = #tpu.dot_dimension_numbers<[2], [0], [0, 1], [1], [0, 0, 0, 1, 1, 1], [], []>} : vector<2x1x32xbf16>, vector<32x32xbf16>, vector<2x1x32xf32> -> vector<2x1x32xf32>
    "tpu.trace_stop"() : () -> ()
    %c0_51 = arith.constant 0 : index
    %c0_52 = arith.constant 0 : index
    %c0_53 = arith.constant 0 : index
    %52 = vector.load %arg19[%c0_51, %c0_52, %c0_53] : memref<1x1x32xf32, #tpu.memory_space<vmem>>, vector<1x1x32xf32>
    %53 = vector.broadcast %52 : vector<1x1x32xf32> to vector<2x1x32xf32>
    %54 = arith.addf %51, %53 : vector<2x1x32xf32>
    %c0_54 = arith.constant 0 : index
    %c0_55 = arith.constant 0 : index
    %c0_56 = arith.constant 0 : index
    %55 = vector.load %arg20[%c0_54, %c0_55, %c0_56] : memref<1x8x32xf32, #tpu.memory_space<vmem>>, vector<1x8x32xf32>
    %56 = vector.broadcast %55 : vector<1x8x32xf32> to vector<2x8x32xf32>
    %57 = vector.broadcast %54 : vector<2x1x32xf32> to vector<2x8x32xf32>
    %58 = arith.addf %56, %57 : vector<2x8x32xf32>
    %c0_57 = arith.constant 0 : index
    %c0_58 = arith.constant 0 : index
    %c0_59 = arith.constant 0 : index
    %59 = vector.load %arg3[%c0_57, %c0_58, %c0_59] : memref<2x1x8xf32, #tpu.memory_space<vmem>>, vector<2x1x8xf32>
    %60 = arith.truncf %58 : vector<2x8x32xf32> to vector<2x8x32xbf16>
    "tpu.trace_start"() <{level = 10 : i32, message = "bqd,bkd->bqk"}> : () -> ()
    %cst_60 = arith.constant dense<0.000000e+00> : vector<2x8x8xf32>
    %61 = tpu.matmul %60, %46, %cst_60 {dimension_numbers = #tpu.dot_dimension_numbers<[2], [2], [1], [1], [0, 0, 0, 1, 1, 1], [0], [0]>} : vector<2x8x32xbf16>, vector<2x8x32xbf16>, vector<2x8x8xf32> -> vector<2x8x8xf32>
    "tpu.trace_stop"() : () -> ()
    %cst_61 = arith.constant 0.176776692 : f32
    %62 = vector.broadcast %cst_61 : f32 to vector<2x8x8xf32>
    %63 = arith.mulf %61, %62 : vector<2x8x8xf32>
    %cst_62 = arith.constant 5.000000e-01 : f32
    %64 = vector.broadcast %cst_62 : f32 to vector<2x1x8xf32>
    %65 = arith.cmpf ogt, %59, %64 : vector<2x1x8xf32>
    %cst_63 = arith.constant -1.000000e+09 : f32
    %66 = vector.shape_cast %65 : vector<2x1x8xi1> to vector<2x1x8xi1>
    %67 = vector.broadcast %66 : vector<2x1x8xi1> to vector<2x8x8xi1>
    %68 = vector.broadcast %cst_63 : f32 to vector<2x8x8xf32>
    %69 = arith.select %67, %68, %63 : vector<2x8x8xi1>, vector<2x8x8xf32>
    %cst_64 = arith.constant dense<0xFF800000> : vector<2x8xf32>
    %70 = vector.multi_reduction <maximumf>, %69, %cst_64 [2] : vector<2x8x8xf32> to vector<2x8xf32>
    %71 = vector.shape_cast %70 : vector<2x8xf32> to vector<2x8x1xf32>
    %72 = vector.broadcast %71 : vector<2x8x1xf32> to vector<2x8x8xf32>
    %73 = arith.subf %69, %72 : vector<2x8x8xf32>
    %74 = math.exp %73 : vector<2x8x8xf32>
    %cst_65 = arith.constant dense<0.000000e+00> : vector<2x8xf32>
    %75 = vector.multi_reduction <add>, %74, %cst_65 [2] : vector<2x8x8xf32> to vector<2x8xf32>
    %76 = vector.shape_cast %75 : vector<2x8xf32> to vector<2x8x1xf32>
    %77 = tpu.reciprocal %76 {approx = true} : vector<2x8x1xf32> -> vector<2x8x1xf32>
    %78 = vector.broadcast %77 : vector<2x8x1xf32> to vector<2x8x8xf32>
    %79 = arith.mulf %74, %78 : vector<2x8x8xf32>
    %80 = arith.truncf %79 : vector<2x8x8xf32> to vector<2x8x8xbf16>
    "tpu.trace_start"() <{level = 10 : i32, message = "bqk,bkd->bqd"}> : () -> ()
    %cst_66 = arith.constant dense<0.000000e+00> : vector<2x8x32xf32>
    %81 = tpu.matmul %80, %46, %cst_66 {dimension_numbers = #tpu.dot_dimension_numbers<[2], [1], [1], [2], [0, 0, 0, 1, 1, 2], [0], [0]>} : vector<2x8x8xbf16>, vector<2x8x32xbf16>, vector<2x8x32xf32> -> vector<2x8x32xf32>
    "tpu.trace_stop"() : () -> ()
    %82 = arith.addf %58, %81 : vector<2x8x32xf32>
    %83 = arith.truncf %82 : vector<2x8x32xf32> to vector<2x8x32xbf16>
    "tpu.trace_start"() <{level = 10 : i32, message = "bqd,bkd->bqk"}> : () -> ()
    %cst_67 = arith.constant dense<0.000000e+00> : vector<2x8x64xf32>
    %84 = tpu.matmul %83, %18, %cst_67 {dimension_numbers = #tpu.dot_dimension_numbers<[2], [2], [1], [1], [0, 0, 0, 1, 1, 1], [0], [0]>} : vector<2x8x32xbf16>, vector<2x64x32xbf16>, vector<2x8x64xf32> -> vector<2x8x64xf32>
    "tpu.trace_stop"() : () -> ()
    %cst_68 = arith.constant 0.176776692 : f32
    %85 = vector.broadcast %cst_68 : f32 to vector<2x8x64xf32>
    %86 = arith.mulf %84, %85 : vector<2x8x64xf32>
    %cst_69 = arith.constant dense<0xFF800000> : vector<2x8xf32>
    %87 = vector.multi_reduction <maximumf>, %86, %cst_69 [2] : vector<2x8x64xf32> to vector<2x8xf32>
    %88 = vector.shape_cast %87 : vector<2x8xf32> to vector<2x8x1xf32>
    %89 = vector.broadcast %88 : vector<2x8x1xf32> to vector<2x8x64xf32>
    %90 = arith.subf %86, %89 : vector<2x8x64xf32>
    %91 = math.exp %90 : vector<2x8x64xf32>
    %cst_70 = arith.constant dense<0.000000e+00> : vector<2x8xf32>
    %92 = vector.multi_reduction <add>, %91, %cst_70 [2] : vector<2x8x64xf32> to vector<2x8xf32>
    %93 = vector.shape_cast %92 : vector<2x8xf32> to vector<2x8x1xf32>
    %94 = tpu.reciprocal %93 {approx = true} : vector<2x8x1xf32> -> vector<2x8x1xf32>
    %95 = vector.broadcast %94 : vector<2x8x1xf32> to vector<2x8x64xf32>
    %96 = arith.mulf %91, %95 : vector<2x8x64xf32>
    %97 = arith.truncf %96 : vector<2x8x64xf32> to vector<2x8x64xbf16>
    "tpu.trace_start"() <{level = 10 : i32, message = "bqk,bkd->bqd"}> : () -> ()
    %cst_71 = arith.constant dense<0.000000e+00> : vector<2x8x32xf32>
    %98 = tpu.matmul %97, %18, %cst_71 {dimension_numbers = #tpu.dot_dimension_numbers<[2], [1], [1], [2], [0, 0, 0, 1, 1, 2], [0], [0]>} : vector<2x8x64xbf16>, vector<2x64x32xbf16>, vector<2x8x32xf32> -> vector<2x8x32xf32>
    "tpu.trace_stop"() : () -> ()
    %99 = arith.addf %82, %98 : vector<2x8x32xf32>
    %100 = arith.truncf %99 : vector<2x8x32xf32> to vector<2x8x32xbf16>
    %c0_72 = arith.constant 0 : index
    %c0_73 = arith.constant 0 : index
    %101 = vector.load %arg21[%c0_72, %c0_73] : memref<32x64xbf16, #tpu.memory_space<vmem>>, vector<32x64xbf16>
    "tpu.trace_start"() <{level = 10 : i32, message = "bqd,df->bqf"}> : () -> ()
    %cst_74 = arith.constant dense<0.000000e+00> : vector<2x8x64xf32>
    %102 = tpu.matmul %100, %101, %cst_74 {dimension_numbers = #tpu.dot_dimension_numbers<[2], [0], [0, 1], [1], [0, 0, 0, 1, 1, 1], [], []>} : vector<2x8x32xbf16>, vector<32x64xbf16>, vector<2x8x64xf32> -> vector<2x8x64xf32>
    "tpu.trace_stop"() : () -> ()
    %c0_75 = arith.constant 0 : index
    %c0_76 = arith.constant 0 : index
    %c0_77 = arith.constant 0 : index
    %103 = vector.load %arg22[%c0_75, %c0_76, %c0_77] : memref<1x1x64xf32, #tpu.memory_space<vmem>>, vector<1x1x64xf32>
    %104 = vector.broadcast %103 : vector<1x1x64xf32> to vector<2x8x64xf32>
    %105 = arith.addf %102, %104 : vector<2x8x64xf32>
    %cst_78 = arith.constant 0.000000e+00 : f32
    %106 = vector.broadcast %cst_78 : f32 to vector<2x8x64xf32>
    %107 = arith.maximumf %105, %106 : vector<2x8x64xf32>
    %108 = arith.truncf %107 : vector<2x8x64xf32> to vector<2x8x64xbf16>
    %c0_79 = arith.constant 0 : index
    %c0_80 = arith.constant 0 : index
    %109 = vector.load %arg23[%c0_79, %c0_80] : memref<64x32xbf16, #tpu.memory_space<vmem>>, vector<64x32xbf16>
    "tpu.trace_start"() <{level = 10 : i32, message = "bqf,fd->bqd"}> : () -> ()
    %cst_81 = arith.constant dense<0.000000e+00> : vector<2x8x32xf32>
    %110 = tpu.matmul %108, %109, %cst_81 {dimension_numbers = #tpu.dot_dimension_numbers<[2], [0], [0, 1], [1], [0, 0, 0, 1, 1, 1], [], []>} : vector<2x8x64xbf16>, vector<64x32xbf16>, vector<2x8x32xf32> -> vector<2x8x32xf32>
    "tpu.trace_stop"() : () -> ()
    %111 = arith.addf %99, %110 : vector<2x8x32xf32>
    %c0_82 = arith.constant 0 : index
    %c0_83 = arith.constant 0 : index
    %c0_84 = arith.constant 0 : index
    %112 = vector.load %arg24[%c0_82, %c0_83, %c0_84] : memref<1x1x32xf32, #tpu.memory_space<vmem>>, vector<1x1x32xf32>
    %113 = vector.broadcast %112 : vector<1x1x32xf32> to vector<2x8x32xf32>
    %114 = arith.addf %111, %113 : vector<2x8x32xf32>
    %115 = arith.truncf %114 : vector<2x8x32xf32> to vector<2x8x32xbf16>
    %c0_85 = arith.constant 0 : index
    %c0_86 = arith.constant 0 : index
    %116 = vector.load %arg25[%c0_85, %c0_86] : memref<32x4xbf16, #tpu.memory_space<vmem>>, vector<32x4xbf16>
    "tpu.trace_start"() <{level = 10 : i32, message = "bqd,de->bqe"}> : () -> ()
    %cst_87 = arith.constant dense<0.000000e+00> : vector<2x8x4xf32>
    %117 = tpu.matmul %115, %116, %cst_87 {dimension_numbers = #tpu.dot_dimension_numbers<[2], [0], [0, 1], [1], [0, 0, 0, 1, 1, 1], [], []>} : vector<2x8x32xbf16>, vector<32x4xbf16>, vector<2x8x4xf32> -> vector<2x8x4xf32>
    "tpu.trace_stop"() : () -> ()
    %c0_88 = arith.constant 0 : index
    %c0_89 = arith.constant 0 : index
    %c0_90 = arith.constant 0 : index
    %118 = vector.load %arg26[%c0_88, %c0_89, %c0_90] : memref<1x1x4xf32, #tpu.memory_space<vmem>>, vector<1x1x4xf32>
    %119 = vector.broadcast %118 : vector<1x1x4xf32> to vector<2x8x4xf32>
    %120 = arith.addf %117, %119 : vector<2x8x4xf32>
    %c0_91 = arith.constant 0 : index
    %c0_92 = arith.constant 0 : index
    %c0_93 = arith.constant 0 : index
    %121 = vector.load %arg29[%c0_91, %c0_92, %c0_93] : memref<2x8x4xf32, #tpu.memory_space<vmem>>, vector<2x8x4xf32>
    tpu.vector_store %arg29[%c0_91, %c0_92, %c0_93], %120 {strides = array<i32>} : memref<2x8x4xf32, #tpu.memory_space<vmem>>, vector<2x8x4xf32>,
    %c0_94 = arith.constant 0 : index
    %c0_95 = arith.constant 0 : index
    %122 = vector.load %arg27[%c0_94, %c0_95] : memref<32x32xbf16, #tpu.memory_space<vmem>>, vector<32x32xbf16>
    "tpu.trace_start"() <{level = 10 : i32, message = "bqd,de->bqe"}> : () -> ()
    %cst_96 = arith.constant dense<0.000000e+00> : vector<2x8x32xf32>
    %123 = tpu.matmul %115, %122, %cst_96 {dimension_numbers = #tpu.dot_dimension_numbers<[2], [0], [0, 1], [1], [0, 0, 0, 1, 1, 1], [], []>} : vector<2x8x32xbf16>, vector<32x32xbf16>, vector<2x8x32xf32> -> vector<2x8x32xf32>
    "tpu.trace_stop"() : () -> ()
    %c0_97 = arith.constant 0 : index
    %c0_98 = arith.constant 0 : index
    %c0_99 = arith.constant 0 : index
    %124 = vector.load %arg28[%c0_97, %c0_98, %c0_99] : memref<1x1x32xf32, #tpu.memory_space<vmem>>, vector<1x1x32xf32>
    %125 = vector.broadcast %124 : vector<1x1x32xf32> to vector<2x8x32xf32>
    %126 = arith.addf %123, %125 : vector<2x8x32xf32>
    %127 = arith.truncf %126 : vector<2x8x32xf32> to vector<2x8x32xbf16>
    "tpu.trace_start"() <{level = 10 : i32, message = "bqd,bkd->bqk"}> : () -> ()
    %cst_100 = arith.constant dense<0.000000e+00> : vector<2x8x64xf32>
    %128 = tpu.matmul %127, %20, %cst_100 {dimension_numbers = #tpu.dot_dimension_numbers<[2], [2], [1], [1], [0, 0, 0, 1, 1, 1], [0], [0]>} : vector<2x8x32xbf16>, vector<2x64x32xbf16>, vector<2x8x64xf32> -> vector<2x8x64xf32>
    "tpu.trace_stop"() : () -> ()
    %c0_101 = arith.constant 0 : index
    %c0_102 = arith.constant 0 : index
    %c0_103 = arith.constant 0 : index
    %129 = vector.load %arg30[%c0_101, %c0_102, %c0_103] : memref<2x8x64xf32, #tpu.memory_space<vmem>>, vector<2x8x64xf32>
    tpu.vector_store %arg30[%c0_101, %c0_102, %c0_103], %128 {strides = array<i32>} : memref<2x8x64xf32, #tpu.memory_space<vmem>>, vector<2x8x64xf32>,
    return
  }
}

</mosaic_0001>

<bundles_post_ra>
// kernel: m_forward.1
= control target key start
LH: loop header
LB: loop body
LE: loop exit
PB: predicated region body
PF: predicated region fallthrough
CT: control target
= control target key end

     0   :  { %s2746_s6 = smov 1   ;;  %s2747_s10 = smov 2   ;;  %s3324_s0 = inlined_call_operand.smem [shape: u32[33], index: -1, kind: input, shape index: {}] }
   0x1   :  { %s2794_s5 = sld [smem:[%s3324_s0]]   ;;  %s2748_s14 = smov 3  }
   0x2   :  { %s2799_s9 = sld [smem:[%s3324_s0 + %s2746_s6]]   ;;  %s2749_s18 = smov 4  }
   0x3   :  { %s2804_s13 = sld [smem:[%s3324_s0 + %s2747_s10]]   ;;  %s2750_s22 = smov 5  }
   0x4   :  { %s2809_s17 = sld [smem:[%s3324_s0 + %s2748_s14]]   ;;  %s2751_s26 = smov 6  }
   0x5   :  { %s2814_s21 = sld [smem:[%s3324_s0 + %s2749_s18]]   ;;  %s2752_s30 = smov 7  }
   0x6   :  { %s2819_s25 = sld [smem:[%s3324_s0 + %s2750_s22]]   ;;  %s2753_s4 = smov 8  }
   0x7   :  { %s2824_s29 = sld [smem:[%s3324_s0 + %s2751_s26]]   ;;  %s2754_s10 = smov 9  }
   0x8   :  { %s2829_s3 = sld [smem:[%s3324_s0 + %s2752_s30]]   ;;  %s2755_s15 = smov 10  }
   0x9   :  { %3332 = sst [smem:[#allocation8_spill]] %s2804_s13  ;;  %s2756_s20 = smov 11  }
   0xa   :  { %3333 = sst [smem:[#allocation9_spill]] %s2809_s17  ;;  %s2757_s26 = smov 12  }
   0xb   :  { %s2834_s8 = sld [smem:[%s3324_s0 + %s2753_s4]]   ;;  %s2758_s1 = smov 13  }
   0xc   :  { %s2839_s14 = sld [smem:[%s3324_s0 + %s2754_s10]]   ;;  %s2759_s7 = smov 14  }
   0xd   :  { %s2844_s19 = sld [smem:[%s3324_s0 + %s2755_s15]]   ;;  %s2760_s15 = smov 15  }
   0xe   :  { %s2849_s24 = sld [smem:[%s3324_s0 + %s2756_s20]]   ;;  %s2761_s22 = smov 16  }
   0xf   :  { %s2854_s30 = sld [smem:[%s3324_s0 + %s2757_s26]]   ;;  %s2762_s28 = smov 17  }
  0x10   :  { %s2859_s6 = sld [smem:[%s3324_s0 + %s2758_s1]]  }
  0x11   :  { %s2864_s12 = sld [smem:[%s3324_s0 + %s2759_s7]]   ;;  %s2763_s7 = smov 18  }
  0x12   :  { %s2869_s20 = sld [smem:[%s3324_s0 + %s2760_s15]]   ;;  %s2764_s15 = smov 19  }
  0x13   :  { %s2874_s27 = sld [smem:[%s3324_s0 + %s2761_s22]]   ;;  %s2765_s22 = smov 20  }
  0x14   :  { %s2879_s4 = sld [smem:[%s3324_s0 + %s2762_s28]]   ;;  %s2766_s28 = smov 21  }
  0x15   :  { %3334 = sst [smem:[#allocation10_spill]] %s2854_s30 }
  0x16   :  { %s2884_s17 = sld [smem:[%s3324_s0 + %s2763_s7]]   ;;  %s2767_s7 = smov 22  }
  0x17   :  { %s2894_s30 = sld [smem:[%s3324_s0 + %s2765_s22]]   ;;  %s2769_s22 = smov 24  }
  0x18   :  { %3335 = sst [smem:[#allocation11_spill]] %s2869_s20 }
  0x19   :  { %s2889_s20 = sld [smem:[%s3324_s0 + %s2764_s15]]   ;;  %s2768_s15 = smov 23  }
  0x1a   :  { %s2899_s13 = sld [smem:[%s3324_s0 + %s2766_s28]]   ;;  %s2770_s28 = smov 25  }
  0x1c   :  { %3336 = sst [smem:[#allocation12_spill]] %s2884_s17 }
  0x1d   :  { %3338 = sst [smem:[#allocation14_spill]] %s2894_s30 }
  0x1e   :  { %s2904_s17 = sld [smem:[%s3324_s0 + %s2767_s7]]   ;;  %s2771_s7 = smov 26  }
  0x1f   :  { %3337 = sst [smem:[#allocation13_spill]] %s2889_s20 }
  0x20   :  { %3339 = sst [smem:[#allocation15_spill]] %s2899_s13 }
  0x21   :  { %s2909_s20 = sld [smem:[%s3324_s0 + %s2768_s15]]   ;;  %s2772_s15 = smov 27  }
  0x22   :  { %s2914_s30 = sld [smem:[%s3324_s0 + %s2769_s22]]   ;;  %s2773_s22 = smov 28  }
  0x23   :  { %s2919_s13 = sld [smem:[%s3324_s0 + %s2770_s28]]   ;;  %s2774_s28 = smov 29  }
  0x24   :  { %3340 = sst [smem:[#allocation16_spill]] %s2904_s17 }
  0x25   :  { %s2924_s17 = sld [smem:[%s3324_s0 + %s2771_s7]]   ;;  %s2775_s7 = smov 30  }
  0x27   :  { %3341 = sst [smem:[#allocation17_spill]] %s2909_s20 }
  0x28   :  { %3342 = sst [smem:[#allocation18_spill]] %s2914_s30 }
  0x29   :  { %3343 = sst [smem:[#allocation19_spill]] %s2919_s13 }
  0x2a   :  { %s2929_s20 = sld [smem:[%s3324_s0 + %s2772_s15]]   ;;  %s2776_s15 = smov 31  }
  0x2b   :  { %3344 = sst [smem:[#allocation20_spill]] %s2924_s17 }
  0x2c   :  { %s2934_s30 = sld [smem:[%s3324_s0 + %s2773_s22]]   ;;  %s2777_s22 = smov 32  }
  0x2d   :  { %s2939_s13 = sld [smem:[%s3324_s0 + %s2774_s28]]  }
  0x2e   :  { %s2944_s17 = sld [smem:[%s3324_s0 + %s2775_s7]]  }
  0x30   :  { %3345 = sst [smem:[#allocation21_spill]] %s2929_s20 }
  0x31   :  { %s2949_s20 = sld [smem:[%s3324_s0 + %s2776_s15]]  }
  0x32   :  { %3346 = sst [smem:[#allocation22_spill]] %s2934_s30 }
  0x33   :  { %s2954_s30 = sld [smem:[%s3324_s0 + %s2777_s22]]  }
  0x34   :  { %71 = vsyncpa [#allocation3], 0  ;;  %v2649_v0 = vld [vmem:[%s2814_s21 + $0x10] sm:$0xff]   ;;  %v2650_v1 = vld [vmem:[%s2814_s21 + $0x8] sm:$0xff]   ;;  %vm219_vm0 = vcmask 392192  }
  0x35   :  { %2343 = vmatprep.subr.bf16.mxu0 %v2649_v0  ;;  %v2652_v2 = vld [vmem:[%s2794_s5] sm:$0xff]   ;;  %v2653_v4 = vld [vmem:[%s2794_s5 + $0x8] sm:$0xff]   ;;  %v2654_v5 = vld [vmem:[%s2794_s5 + $0x10] sm:$0xff]  }
  0x36   :  { %2344 = vmatpush3.bf16.msra.mxu0 %v2649_v0  ;;  %v2651_v3 = vld [vmem:[%s2814_s21] sm:$0xff]   ;;  %2349 = vmatprep.mubr.msk.bf16.mxu0 %vm219_vm0, %v2652_v2  ;;  %v2655_v6 = vld [vmem:[%s2794_s5 + $0x18] sm:$0xff]   ;;  %v2657_v8 = vld [vmem:[%s2794_s5 + $0x28] sm:$0xff]  }
  0x37   :  { %2345 = vmatprep.subr.bf16.mxu0 %v2650_v1  ;;  %v2656_v7 = vld [vmem:[%s2794_s5 + $0x20] sm:$0xff]   ;;  %v2658_v9 = vld [vmem:[%s2794_s5 + $0x30] sm:$0xff]  }
  0x3a   :  { %2346 = vmatpush3.bf16.msra.mxu0 %v2650_v1 }
  0x3b   :  { %2347 = vmatprep.subr.bf16.mxu0 %v2651_v3 }
  0x3e   :  { %2348 = vmatpush3.bf16.msra.mxu0 %v2651_v3 }
  0x41   :  { %2350 = vmatmul.mubr.msk.bf16.vlgmr.msra.gmra.mxu0 %vm219_vm0, %v2653_v4 }
  0x42   :  { %2353 = vmatprep.mubr.msk.bf16.mxu0 %vm219_vm0, %v2654_v5 }
  0x49   :  { %2354 = vmatmul.mubr.msk.bf16.gmra.mxu0 %vm219_vm0, %v2655_v6 }
  0x4a   :  { %2357 = vmatprep.mubr.msk.bf16.mxu0 %vm219_vm0, %v2656_v7 }
  0x4b   :  { %72 = vsyncpa [#allocation5], 0  ;;  %v2659_v10 = vld [vmem:[%s2794_s5 + $0x38] sm:$0xff]   ;;  %v2660_v11 = vld [vmem:[%s2824_s29 + $0x8] sm:$0xff]   ;;  %vm372_vm1 = vcmask 261120   ;;  %v2778_v58 = vmov 0.0  }
  0x4c   :  { %2365 = vmatprep.subr.bf16.mxu1 %v2660_v11  ;;  %v2661_v12 = vld [vmem:[%s2824_s29] sm:$0xff]   ;;  %v2662_v13 = vld [vmem:[%s2834_s8 + $0x8] sm:$0xff]   ;;  %vm2779_vm2 = vmmov 0   ;;  %s3347_s0 = sld [smem:[#allocation8_spill]]  ;;  %vm973_vm3 = vcmask 1043456   ;;  %vm969_vm4 = vcmask 64512  }
  0x4d   :  { %2366 = vmatpush3.bf16.msra.mxu1 %v2660_v11  ;;  %v2664_v14 = vld [vmem:[%s2844_s19] sm:$0xff]   ;;  %v2665_v57 = vld [vmem:[%s2844_s19 + $0x8] sm:$0xff]   ;;  %s3348_s5 = sld [smem:[#allocation10_spill]]  ;;  %vm1075_vm5 = vcmask 1041409   ;;  %vm1524_vm10 = vcmask 523264   ;;  %vm1881_vm11 = vcmask 31744  }
  0x4e   :  { %2367 = vmatprep.subr.bf16.mxu1 %v2661_v12  ;;  %v2132_v18 = vld [vmem:[%s2819_s25] ss:$0 sm:$0xff]  ;;  %v2666_v59 = vld [vmem:[%s2874_s27 + $0x8] sm:$0xff]   ;;  %s3350_s21 = sld [smem:[#allocation11_spill]]  ;;  %s2782_s28 = smov [#allocation2]  }
  0x4f   :  { %v2663_v28 = vld [vmem:[%s2834_s8] sm:$0xff]   ;;  %v2668_v60 = vld [vmem:[%s2849_s24 + $0x8] sm:$0xff]   ;;  %s3351_s25 = sld [smem:[#allocation13_spill]]  ;;  %s2071_s1 = sshll.u32 %s2782_s28, 4  ;;  %s2072_s1 = int_to_ptr.vmem [resolvable:$true] %s2071_s1 }
  0x50   :  { %v2667_v61 = vld [vmem:[%s2874_s27] sm:$0xff]   ;;  %s3352_s29 = sld [smem:[#allocation14_spill]]  ;;  %s2783_s2 = smov [#allocation4]  }
  0x51   :  { %2358 = vmatmul.mubr.msk.bf16.gmra.mxu0 %vm219_vm0, %v2657_v8  ;;  %2368 = vmatpush3.bf16.msra.mxu1 %v2661_v12  ;;  %v2670_v62 = vld [vmem:[%s2849_s24] sm:$0xff]   ;;  %s3354_s8 = sld [smem:[#allocation15_spill]]  ;;  %s2084_s7 = sshll.u32 %s2783_s2, 4  ;;  %s2085_s7 = int_to_ptr.vmem [resolvable:$true] %s2084_s7 }
  0x52   :  { %2361 = vmatprep.mubr.msk.bf16.mxu0 %vm219_vm0, %v2658_v9  ;;  %2385 = vmatprep.subr.bf16.mxu1 %v2662_v13  ;;  %v2669_v63 = vld [vmem:[%s2799_s9] sm:$0xff]   ;;  %s3349_s9 = sld [smem:[#allocation12_spill]]  ;;  %s2702_s10 = scalar_lea.vmem %s2072_s1, 512 }
  0x53   :  { %v2152_v1 = vld [vmem:[%s2829_s3] ss:$0 sm:$0xff]  ;;  %s3353_s3 = sld [smem:[#allocation9_spill]]  ;;  %p2703_p0 = scmp.ne.s32.totalorder %s2072_s1, %s2702_s10 }
  0x54   :  { %s3356_s19 = sld [smem:[#allocation16_spill]]  ;;  %p2707_p1 = scmp.lt.s32.totalorder %s2072_s1, %s2072_s1 }
  0x55   :  { %s3357_s24 = sld [smem:[#allocation19_spill]]  ;;  %p2708_p2 = scmp.lt.s32.totalorder %s2702_s10, %s2702_s10 }
  0x56   :  { %s3360_s27 = sld [smem:[#allocation20_spill]] }
  0x57   :  { %p2709_p3 = por %p2708_p2, %p2707_p1 }
  0x59   :  { %2362 = vmatmul.mubr.msk.bf16.gmra.mxu0 %vm219_vm0, %v2659_v10  ;;  %p2710_p4 = pnand %p2709_p3, %p2703_p0 }
  0x5a   :  { %2421 = vmatprep.mubr.bf16.mxu0 %v2664_v14 }
 0x101   :  { %v2351_v15 = vpop.f32.mrf.mxu0 }
 0x102   :  { %v287_v23 = vadd.f32 %v2351_v15, %v2132_v18 }
 0x103   :  { %v278_v16 = vpop.f32.mrf.mxu0 }
 0x104   :  { %v279_v21 = vadd.f32 %v2132_v18, %v278_v16 }
 0x105   :  { %v2352_v17 = vpop.f32.mrf.mxu0 }
 0x106   :  { %v290_v19 = vadd.f32 %v2352_v17, %v2132_v18 }
 0x107   :  { %v281_v20 = vpop.f32.mrf.mxu0 }
 0x108   :  { %v282_v22 = vadd.f32 %v2132_v18, %v281_v20  ;;  %v342_v26 = vpack.c.bf16 %v290_v19, %v287_v23 }
 0x109   :  { %v2355_v24 = vpop.f32.mrf.mxu0 }
 0x10a   :  { %v2980_v25 = vpack.c.bf16 %v282_v22, %v279_v21  ;;  %v303_v34 = vadd.f32 %v2355_v24, %v2132_v18 }
 0x10b   :  { %v294_v27 = vpop.f32.mrf.mxu0 }
 0x10c   :  { %2369 = vmatprep.mubr.msk.bf16.mxu1 %vm372_vm1, %v2980_v25  ;;  %v295_v32 = vadd.f32 %v2132_v18, %v294_v27 }
 0x10d   :  { %v2356_v29 = vpop.f32.mrf.mxu0  ;;  %2370 = vmatmul.mubr.msk.bf16.vlgmr.msra.gmra.mxu1 %vm372_vm1, %v342_v26 }
 0x10e   :  { %2386 = vmatpush3.bf16.msra.mxu1 %v2662_v13  ;;  %v306_v30 = vadd.f32 %v2356_v29, %v2132_v18 }
 0x10f   :  { %v297_v31 = vpop.f32.mrf.mxu0  ;;  %2387 = vmatprep.subr.bf16.mxu1 %v2663_v28 }
 0x110   :  { %v298_v33 = vadd.f32 %v2132_v18, %v297_v31  ;;  %v344_v37 = vpack.c.bf16 %v306_v30, %v303_v34 }
 0x111   :  { %v2359_v35 = vpop.f32.mrf.mxu0 }
 0x112   :  { %v343_v36 = vpack.c.bf16 %v298_v33, %v295_v32  ;;  %2388 = vmatpush3.bf16.msra.mxu1 %v2663_v28  ;;  %v319_v44 = vadd.f32 %v2359_v35, %v2132_v18 }
 0x113   :  { %v310_v38 = vpop.f32.mrf.mxu0  ;;  %2449 = vmatprep.subr.bf16.mxu1 %v2778_v58 }
 0x114   :  { %2373 = vmatprep.mubr.msk.bf16.mxu1 %vm372_vm1, %v343_v36  ;;  %v311_v42 = vadd.f32 %v2132_v18, %v310_v38 }
 0x115   :  { %v2360_v39 = vpop.f32.mrf.mxu0  ;;  %2374 = vmatmul.mubr.msk.bf16.gmra.mxu1 %vm372_vm1, %v344_v37 }
 0x116   :  { %v322_v40 = vadd.f32 %v2360_v39, %v2132_v18 }
 0x117   :  { %v313_v41 = vpop.f32.mrf.mxu0 }
 0x118   :  { %v314_v43 = vadd.f32 %v2132_v18, %v313_v41  ;;  %v346_v47 = vpack.c.bf16 %v322_v40, %v319_v44 }
 0x119   :  { %v2363_v45 = vpop.f32.mrf.mxu0 }
 0x11a   :  { %v345_v46 = vpack.c.bf16 %v314_v43, %v311_v42  ;;  %v335_v50 = vadd.f32 %v2363_v45, %v2132_v18  ;;  %v2163_v42 = vld [vmem:[%s2839_s14] ss:$0 sm:$0xff]  ;;  %s3355_s14 = sld [smem:[#allocation17_spill]] }
 0x11b   :  { %v326_v48 = vpop.f32.mrf.mxu0 }
 0x11c   :  { %2377 = vmatprep.mubr.msk.bf16.mxu1 %vm372_vm1, %v345_v46  ;;  %v327_v53 = vadd.f32 %v2132_v18, %v326_v48 }
 0x11d   :  { %v2364_v49 = vpop.f32.mrf.mxu0  ;;  %2378 = vmatmul.mubr.msk.bf16.gmra.mxu1 %vm372_vm1, %v346_v47 }
 0x11e   :  { %v338_v51 = vadd.f32 %v2364_v49, %v2132_v18 }
 0x11f   :  { %v329_v52 = vpop.f32.mrf.mxu0 }
 0x120   :  { %v348_v54 = vpack.c.bf16 %v338_v51, %v335_v50  ;;  %v330_v55 = vadd.f32 %v2132_v18, %v329_v52 }
 0x122   :  { %v347_v56 = vpack.c.bf16 %v330_v55, %v327_v53  ;;  %2405 = vmatprep.subr.bf16.mxu0 %v348_v54 }
 0x123   :  { %2406 = vmatpush3.bf16.msra.mxu0 %v348_v54 }
 0x124   :  { %2381 = vmatprep.mubr.msk.bf16.mxu1 %vm372_vm1, %v347_v56  ;;  %2407 = vmatprep.subr.bf16.mxu0 %v347_v56 }
 0x125   :  { %2382 = vmatmul.mubr.msk.bf16.gmra.mxu1 %vm372_vm1, %v348_v54 }
 0x126   :  { %2389 = vmatprep.mubr.msk.bf16.mxu1 %vm372_vm1, %v2980_v25 }
 0x127   :  { %2408 = vmatpush3.bf16.msra.mxu0 %v347_v56 }
 0x128   :  { %2409 = vmatprep.subr.bf16.mxu0 %v346_v47 }
 0x12b   :  { %2410 = vmatpush3.bf16.msra.mxu0 %v346_v47 }
 0x12c   :  { %2411 = vmatprep.subr.bf16.mxu0 %v345_v46 }
 0x12d   :  { %2390 = vmatmul.mubr.msk.bf16.vlgmr.msra.gmra.mxu1 %vm372_vm1, %v342_v26 }
 0x12e   :  { %2393 = vmatprep.mubr.msk.bf16.mxu1 %vm372_vm1, %v343_v36  ;;  %2450 = vmatpush3.bf16.msra.mxu1 %v2666_v59 }
 0x12f   :  { %2412 = vmatpush3.bf16.msra.mxu0 %v345_v46  ;;  %2451 = vmatprep.subr.bf16.mxu1 %v2778_v58 }
 0x130   :  { %2413 = vmatprep.subr.bf16.mxu0 %v344_v37 }
 0x132   :  { %2452 = vmatpush3.bf16.msra.mxu1 %v2667_v61 }
 0x133   :  { %2414 = vmatpush3.bf16.msra.mxu0 %v344_v37  ;;  %2463 = vmatprep.subr.bf16.mxu1 %v2778_v58 }
 0x134   :  { %2415 = vmatprep.subr.bf16.mxu0 %v343_v36 }
 0x135   :  { %2394 = vmatmul.mubr.msk.bf16.gmra.mxu1 %vm372_vm1, %v344_v37 }
 0x136   :  { %2397 = vmatprep.mubr.msk.bf16.mxu1 %vm372_vm1, %v345_v46 }
 0x137   :  { %2416 = vmatpush3.bf16.msra.mxu0 %v343_v36 }
 0x138   :  { %2417 = vmatprep.subr.bf16.mxu0 %v342_v26 }
 0x13b   :  { %2418 = vmatpush3.bf16.msra.mxu0 %v342_v26 }
 0x13c   :  { %2419 = vmatprep.subr.bf16.mxu0 %v2980_v25 }
 0x13d   :  { %2398 = vmatmul.mubr.msk.bf16.gmra.mxu1 %vm372_vm1, %v346_v47 }
 0x13e   :  { %2401 = vmatprep.mubr.msk.bf16.mxu1 %vm372_vm1, %v347_v56 }
 0x13f   :  { %2420 = vmatpush3.bf16.msra.mxu0 %v2980_v25 }
 0x140   :  { %2425 = vmatprep.subr.bf16.mxu0 %v2668_v60 }
 0x142   :  { %2422 = vmatmul.mubr.bf16.vlgmr.msra.gmra.mxu0 %v2665_v57 }
 0x143   :  { %2426 = vmatpush3.bf16.msra.mxu0 %v2668_v60 }
 0x144   :  { %2427 = vmatprep.subr.bf16.mxu0 %v2670_v62 }
 0x145   :  { %2402 = vmatmul.mubr.msk.bf16.gmra.mxu1 %vm372_vm1, %v348_v54 }
 0x146   :  { %2453 = vmatprep.mubr.msk.bf16.mxu1 %vm2779_vm2, %v2778_v58 }
 0x147   :  { %2428 = vmatpush3.bf16.msra.mxu0 %v2670_v62 }
 0x148   :  { %2433 = vmatprep.subr.bf16.mxu0 %v2778_v58 }
 0x14d   :  { %2454 = vmatmul.mubr.msk.bf16.vlgmr.msra.gmra.mxu1 %vm372_vm1, %v2669_v63 }
 0x14e   :  { %2465 = vmatprep.mubr.msk.bf16.mxu1 %vm2779_vm2, %v2778_v58 }
 0x1cd   :  { %v2371_v0 = vpop.f32.mrf.mxu1 }
 0x1ce   :  { %v440_v4 = vadd.f32 %v2371_v0, %v2152_v1 }
 0x1cf   :  { %v431_v2 = vpop.f32.mrf.mxu1 }
 0x1d0   :  { %v432_v7 = vadd.f32 %v2152_v1, %v431_v2 }
 0x1d1   :  { %v2372_v3 = vpop.f32.mrf.mxu1 }
 0x1d2   :  { %v443_v5 = vadd.f32 %v2372_v3, %v2152_v1 }
 0x1d3   :  { %v434_v6 = vpop.f32.mrf.mxu1 }
 0x1d4   :  { %v3019_v8 = vpack.c.bf16 %v443_v5, %v440_v4  ;;  %v435_v9 = vadd.f32 %v2152_v1, %v434_v6 }
 0x1d5   :  { %v2375_v10 = vpop.f32.mrf.mxu1 }
 0x1d6   :  { %v3021_v11 = vpack.c.bf16 %v435_v9, %v432_v7  ;;  %v456_v14 = vadd.f32 %v2375_v10, %v2152_v1 }
 0x1d7   :  { %v447_v12 = vpop.f32.mrf.mxu1 }
 0x1d8   :  { %v448_v17 = vadd.f32 %v2152_v1, %v447_v12 }
 0x1d9   :  { %v2376_v13 = vpop.f32.mrf.mxu1 }
 0x1da   :  { %v459_v15 = vadd.f32 %v2376_v13, %v2152_v1 }
 0x1db   :  { %v450_v16 = vpop.f32.mrf.mxu1 }
 0x1dc   :  { %v3023_v18 = vpack.c.bf16 %v459_v15, %v456_v14  ;;  %v451_v19 = vadd.f32 %v2152_v1, %v450_v16 }
 0x1dd   :  { %v2379_v20 = vpop.f32.mrf.mxu1 }
 0x1de   :  { %v3025_v21 = vpack.c.bf16 %v451_v19, %v448_v17  ;;  %v472_v24 = vadd.f32 %v2379_v20, %v2152_v1 }
 0x1df   :  { %v463_v22 = vpop.f32.mrf.mxu1 }
 0x1e0   :  { %v464_v27 = vadd.f32 %v2152_v1, %v463_v22 }
 0x1e1   :  { %v2380_v23 = vpop.f32.mrf.mxu1 }
 0x1e2   :  { %v475_v25 = vadd.f32 %v2380_v23, %v2152_v1 }
 0x1e3   :  { %v466_v26 = vpop.f32.mrf.mxu1 }
 0x1e4   :  { %v3027_v28 = vpack.c.bf16 %v475_v25, %v472_v24  ;;  %v467_v29 = vadd.f32 %v2152_v1, %v466_v26 }
 0x1e5   :  { %v2383_v30 = vpop.f32.mrf.mxu1 }
 0x1e6   :  { %v3029_v31 = vpack.c.bf16 %v467_v29, %v464_v27  ;;  %v488_v34 = vadd.f32 %v2383_v30, %v2152_v1  ;;  %v779_v30 = vld [vmem:[%s2859_s6] sm:$0xf]  ;;  %s3358_s6 = sld [smem:[#allocation18_spill]] }
 0x1e7   :  { %v479_v32 = vpop.f32.mrf.mxu1 }
 0x1e8   :  { %v480_v37 = vadd.f32 %v2152_v1, %v479_v32  ;;  %v2186_v32 = vld [vmem:[%s2879_s4] ss:$0 sm:$0xff]  ;;  %s3361_s4 = sld [smem:[#allocation22_spill]] }
 0x1e9   :  { %v2384_v33 = vpop.f32.mrf.mxu1 }
 0x1ea   :  { %v491_v35 = vadd.f32 %v2384_v33, %v2152_v1 }
 0x1eb   :  { %v482_v36 = vpop.f32.mrf.mxu1 }
 0x1ec   :  { %v3031_v38 = vpack.c.bf16 %v491_v35, %v488_v34  ;;  %v483_v39 = vadd.f32 %v2152_v1, %v482_v36 }
 0x1ed   :  { %v2391_v40 = vpop.f32.mrf.mxu1 }
 0x1ee   :  { %v3033_v41 = vpack.c.bf16 %v483_v39, %v480_v37  ;;  %v3036_v45 = vadd.f32 %v2391_v40, %v2163_v42 }
 0x1ef   :  { %v551_v43 = vpop.f32.mrf.mxu1 }
 0x1f0   :  { %v3040_v48 = vadd.f32 %v2163_v42, %v551_v43  ;;  %v2671_v43 = vld [vmem:[%s2864_s12 + $0x8] sm:$0xff]  }
 0x1f1   :  { %v2392_v44 = vpop.f32.mrf.mxu1 }
 0x1f2   :  { %v3038_v46 = vadd.f32 %v2392_v44, %v2163_v42 }
 0x1f3   :  { %v554_v47 = vpop.f32.mrf.mxu1 }
 0x1f4   :  { %v623_v49 = vpack.c.bf16 %v3038_v46, %v3036_v45  ;;  %v3044_v50 = vadd.f32 %v2163_v42, %v554_v47 }
 0x1f5   :  { %v2395_v51 = vpop.f32.mrf.mxu1 }
 0x1f6   :  { %v622_v52 = vpack.c.bf16 %v3044_v50, %v3040_v48  ;;  %v3048_v55 = vadd.f32 %v2395_v51, %v2163_v42  ;;  %v2672_v51 = vld [vmem:[%s2864_s12] sm:$0xff]   ;;  %s3359_s12 = sld [smem:[#allocation21_spill]] }
 0x1f7   :  { %v567_v53 = vpop.f32.mrf.mxu1 }
 0x1f8   :  { %v3052_v59 = vadd.f32 %v2163_v42, %v567_v53 }
 0x1f9   :  { %v2396_v54 = vpop.f32.mrf.mxu1 }
 0x1fa   :  { %v3050_v56 = vadd.f32 %v2396_v54, %v2163_v42  ;;  %v968_v54 = vld [vmem:[%s3347_s0 + $0x1] sm:$0x1] }
 0x1fb   :  { %v570_v57 = vpop.f32.mrf.mxu1 }
 0x1fc   :  { %v625_v60 = vpack.c.bf16 %v3050_v56, %v3048_v55  ;;  %v3056_v61 = vadd.f32 %v2163_v42, %v570_v57  ;;  %v2176_v57 = vld [vmem:[%s3348_s5] ss:$0 sm:$0xff]  ;;  %v1957_v55 = vsel %vm372_vm1, %v623_v49, 0  ;;  %v1954_v56 = vsel %vm372_vm1, %v622_v52, 0 }
 0x1fd   :  { %v2399_v62 = vpop.f32.mrf.mxu1 }
 0x1fe   :  { %v624_v63 = vpack.c.bf16 %v3056_v61, %v3052_v59  ;;  %v3060_v0 = vadd.f32 %v2399_v62, %v2163_v42  ;;  %v2682_v59 = vld [vmem:[%s3357_s24 + $0x8] sm:$0xff]   ;;  %v2215_v61 = vld [vmem:[%s3358_s6] ss:$0 sm:$0xff] }
 0x1ff   :  { %v583_v1 = vpop.f32.mrf.mxu1 }
 0x200   :  { %v3062_v2 = vadd.f32 %v2163_v42, %v583_v1 }
 0x201   :  { %v2400_v3 = vpop.f32.mrf.mxu1 }
 0x202   :  { %v3064_v4 = vadd.f32 %v2400_v3, %v2163_v42  ;;  %v2423_v5 = vpop.f32.mrf.mxu0 }
 0x203   :  { %v586_v6 = vpop.f32.mrf.mxu1 }
 0x204   :  { %v627_v7 = vpack.c.bf16 %v3064_v4, %v3060_v0  ;;  %v3068_v9 = vadd.f32 %v2163_v42, %v586_v6  ;;  %v680_v10 = vpop.f32.mrf.mxu0 }
 0x205   :  { %v2403_v12 = vpop.f32.mrf.mxu1 }
 0x206   :  { %v626_v13 = vpack.c.bf16 %v3068_v9, %v3062_v2  ;;  %v3072_v14 = vadd.f32 %v2403_v12, %v2163_v42  ;;  %v2424_v15 = vpop.f32.mrf.mxu0 }
 0x207   :  { %v599_v16 = vpop.f32.mrf.mxu1  ;;  %v696_v23 = vpack.c.bf16 %v2424_v15, %v2423_v5 }
 0x208   :  { %v3074_v17 = vadd.f32 %v2163_v42, %v599_v16  ;;  %v683_v19 = vpop.f32.mrf.mxu0 }
 0x209   :  { %v695_v20 = vpack.c.bf16 %v683_v19, %v680_v10  ;;  %v2404_v22 = vpop.f32.mrf.mxu1 }
 0x20a   :  { %v3076_v24 = vadd.f32 %v2404_v22, %v2163_v42 }
 0x20b   :  { %v602_v25 = vpop.f32.mrf.mxu1  ;;  %2429 = vmatprep.mubr.msk.bf16.mxu0 %vm372_vm1, %v695_v20 }
 0x20c   :  { %v629_v26 = vpack.c.bf16 %v3076_v24, %v3072_v14  ;;  %v3081_v27 = vadd.f32 %v2163_v42, %v602_v25  ;;  %2430 = vmatmul.mubr.msk.bf16.vlgmr.msra.gmra.mxu0 %vm372_vm1, %v696_v23  ;;  %v967_v25 = vld [vmem:[%s3347_s0] sm:$0x1]  ;;  %v2012_v14 = vsel %vm372_vm1, %v627_v7, 0 }
 0x20d   :  { %2434 = vmatpush3.bf16.msra.mxu0 %v696_v23  ;;  %2437 = vmatprep.mubr.msk.bf16.mxu0 %vm2779_vm2, %v2778_v58  ;;  %v958_v33 = vpop.f32.mrf.mxu1  ;;  %v2216_v24 = vld [vmem:[%s3360_s27] ss:$0 sm:$0xff] }
 0x20e   :  { %v628_v29 = vpack.c.bf16 %v3081_v27, %v3074_v17  ;;  %2435 = vmatprep.subr.bf16.mxu0 %v2778_v58  ;;  %v959_v34 = vadd.f32 %v2186_v32, %v958_v33  ;;  %v2009_v17 = vsel %vm372_vm1, %v626_v13, 0 }
 0x20f   :  { %v2455_v35 = vpop.f32.mrf.mxu1 }
 0x210   :  { %v965_v36 = vpack.c.bf16 %v959_v34, %v959_v34  ;;  %v2673_v35 = vld [vmem:[%s3349_s9 + $0x8] sm:$0xff]  }
 0x211   :  { %2436 = vmatpush3.bf16.msra.mxu0 %v695_v20  ;;  %v961_v37 = vpop.f32.mrf.mxu1 }
 0x212   :  { %2441 = vmatprep.subr.bf16.mxu0 %v2778_v58  ;;  %v3095_v39 = vsel %vm973_vm3, %v965_v36, 0  ;;  %v962_v40 = vadd.f32 %v2186_v32, %v961_v37  ;;  %v1193_v53 = vsel %vm372_vm1, %v965_v36, 0  ;;  %v2674_v36 = vld [vmem:[%s3349_s9] sm:$0xff]  }
 0x213   :  { %v2456_v42 = vpop.f32.mrf.mxu1  ;;  %v2182_v37 = vld [vmem:[%s3350_s21] ss:$0 sm:$0xff] }
 0x214   :  { %2438 = vmatmul.mubr.msk.bf16.vlgmr.msra.gmra.mxu0 %vm372_vm1, %v779_v30  ;;  %v3098_v44 = vpack.c.bf16 %v962_v40, %v962_v40 }
 0x215   :  { %2445 = vmatprep.mubr.msk.bf16.mxu0 %vm2779_vm2, %v2778_v58  ;;  %2442 = vmatpush3.bf16.msra.mxu0 %v2671_v43 }
 0x216   :  { %v3101_v47 = vsel %vm973_vm3, %v3098_v44, 0  ;;  %2443 = vmatprep.subr.bf16.mxu0 %v2778_v58 }
 0x217   :  { %2464 = vmatpush3.bf16.msra.mxu1 %v3101_v47 }
 0x218   :  { %2477 = vmatprep.subr.bf16.mxu1 %v2778_v58 }
 0x219   :  { %2444 = vmatpush3.bf16.msra.mxu0 %v2672_v51 }
 0x21a   :  { %2457 = vmatprep.subr.bf16.mxu0 %v2778_v58  ;;  %2466 = vmatmul.mubr.msk.bf16.vlgmr.msra.gmra.mxu1 %vm969_vm4, %v968_v54 }
 0x21b   :  { %2478 = vmatpush3.bf16.xpose.msra.mxu1 %v1193_v53  ;;  %2479 = vmatprep.mubr.msk.bf16.mxu1 %vm2779_vm2, %v2778_v58 }
 0x21c   :  { %2489 = vmatprep.subr.bf16.mxu1 %v2778_v58 }
 0x2cc   :  { %v2431_v62 = vpop.f32.mrf.mxu0 }
 0x2cd   :  { %v769_v1 = vadd.f32 %v2431_v62, %v2176_v57 }
 0x2ce   :  { %v760_v3 = vpop.f32.mrf.mxu0 }
 0x2cf   :  { %777 = vst.msk [vmem:[#allocation2 + $0x10] sm:$0xff] %vm372_vm1, %v769_v1  ;;  %v761_v5 = vadd.f32 %v2176_v57, %v760_v3 }
 0x2d0   :  { %v2432_v6 = vpop.f32.mrf.mxu0 }
 0x2d1   :  { %775 = vst.msk [vmem:[#allocation2] sm:$0xff] %vm372_vm1, %v761_v5  ;;  %v772_v10 = vadd.f32 %v2432_v6, %v2176_v57 }
 0x2d2   :  { %v763_v12 = vpop.f32.mrf.mxu0 }
 0x2d3   :  { %778 = vst.msk [vmem:[#allocation2 + $0x18] sm:$0xff] %vm372_vm1, %v772_v10  ;;  %v764_v15 = vadd.f32 %v2176_v57, %v763_v12 }
 0x2d4   :  { %v817_v16 = vpop.f32.mrf.mxu0 }
 0x2d5   :  { %776 = vst.msk [vmem:[#allocation2 + $0x8] sm:$0xff] %vm372_vm1, %v764_v15  ;;  %v823_v19 = vpack.c.bf16 %v817_v16, %v817_v16 }
 0x2d6   :  { %v2439_v20 = vpop.f32.mrf.mxu0 }
 0x2d7   :  { %2446 = vmatmul.mubr.msk.bf16.vlgmr.msra.gmra.mxu0 %vm372_vm1, %v823_v19  ;;  %v1238_v19 = vsel %vm372_vm1, %v3098_v44, 0  ;;  %v2780_v20 = vmov 1966171168  }
 0x2d8   :  { %2458 = vmatpush3.bf16.msra.mxu0 %v3095_v39  ;;  %v820_v22 = vpop.f32.mrf.mxu0  ;;  %2459 = vmatprep.mubr.msk.bf16.mxu0 %vm2779_vm2, %v2778_v58 }
 0x2d9   :  { %2469 = vmatprep.subr.bf16.mxu0 %v2778_v58  ;;  %v1093_v22 = vunpack.c.l.s4 %v2780_v20 }
 0x2da   :  { %v2440_v23 = vpop.f32.mrf.mxu0  ;;  %v1057_v30 = vpop.f32.mrf.mxu1 }
 0x2db   :  { %v1064_v43 = vpack.c.bf16 %v1057_v30, %v1057_v30  ;;  %v1095_v23 = vlaneseq }
 0x2dc   :  { %v2467_v32 = vpop.f32.mrf.mxu1 }
 0x2dd   :  { %v1073_v54 = vunpack.c.l.b16 %v1064_v43  ;;  %v1096_v30 = vshrl.u32 %v1095_v23, 7  ;;  %v2675_v32 = vld [vmem:[%s3351_s25] ss:$0 sps:$4 sm:$0x11]  }
 0x2de   :  { %v1060_v33 = vpop.f32.mrf.mxu1 }
 0x2df   :  { %2460 = vmatmul.mubr.msk.bf16.vlgmr.msra.gmra.mxu0 %vm969_vm4, %v967_v25  ;;  %v1074_v1 = vrot.slane %v1073_v54, 7  ;;  %v1094_v25 = vunpack.c.0.s8 %v1093_v22  ;;  %v1173_v54 = vld [vmem:[%s3352_s29] sm:$0xff] }
 0x2e0   :  { %2473 = vmatprep.mubr.msk.bf16.mxu0 %vm2779_vm2, %v2778_v58  ;;  %v2468_v34 = vpop.f32.mrf.mxu1  ;;  %2470 = vmatpush3.bf16.msra.mxu0 %v2673_v35 }
 0x2e1   :  { %2471 = vmatprep.subr.bf16.mxu0 %v2778_v58  ;;  %v1097_v33 = vsub.s32 %v1094_v25, %v1096_v30 }
 0x2e3   :  { %v1098_v34 = vrot.slane %v2675_v32, %v1097_v33 }
 0x2e4   :  { %2472 = vmatpush3.bf16.msra.mxu0 %v2674_v36 }
 0x2e5   :  { %2483 = vmatprep.subr.bf16.mxu0 %v2778_v58  ;;  %v1105_v35 = vrot.slane %v1098_v34, %v1097_v33 }
 0x397   :  { %v884_v40 = vpop.f32.mrf.mxu0 }
 0x398   :  { %v885_v42 = vadd.f32 %v2182_v37, %v884_v40 }
 0x399   :  { %v2447_v51 = vpop.f32.mrf.mxu0 }
 0x39a   :  { %890 = vst.msk [vmem:[#allocation4] sm:$0xff] %vm372_vm1, %v885_v42  ;;  %v1176_v42 = vsub.s32 0, %v1096_v30 }
 0x39b   :  { %v887_v53 = vpop.f32.mrf.mxu0 }
 0x39d   :  { %v2448_v57 = vpop.f32.mrf.mxu0 }
 0x39f   :  { %v1011_v62 = vpop.f32.mrf.mxu0 }
 0x3a0   :  { %v1063_v3 = vpack.c.bf16 %v1011_v62, %v1011_v62 }
 0x3a1   :  { %v2461_v5 = vpop.f32.mrf.mxu0 }
 0x3a2   :  { %v1072_v6 = vunpack.c.l.b16 %v1063_v3 }
 0x3a3   :  { %v1014_v10 = vpop.f32.mrf.mxu0 }
 0x3a4   :  { %v1076_v12 = vsel %vm1075_vm5, %v1074_v1, %v1072_v6 }
 0x3a5   :  { %v1077_v15 = vpack.c.b16 %v1076_v12, %v1076_v12  ;;  %v2462_v16 = vpop.f32.mrf.mxu0 }
 0x3a6   :  { %v1187_v16 = vld [vmem:[%s3353_s3 + $0x1] sm:$0x1] }
 0x3a7   :  { %2474 = vmatmul.mubr.msk.bf16.vlgmr.msra.gmra.mxu0 %vm372_vm1, %v1077_v15  ;;  %v1186_v15 = vld [vmem:[%s3353_s3] sm:$0x1]  ;;  %vm1283_vm7 = vcmp.gt.f32.partialorder %v1187_v16, 0.5 }
 0x3a8   :  { %2484 = vmatpush3.bf16.xpose.msra.mxu0 %v1238_v19  ;;  %2485 = vmatprep.mubr.msk.bf16.mxu0 %vm2779_vm2, %v2778_v58  ;;  %vm1282_vm6 = vcmp.gt.f32.partialorder %v1186_v15, 0.5  ;;  %v2781_v19 = vmov 0  }
 0x3a9   :  { %2495 = vmatprep.subr.bf16.mxu0 %v2778_v58  ;;  %v1285_v20 = vsel %vm1283_vm7, 1, %v2781_v19 }
 0x3aa   :  { %v1293_v23 = vrot.slane %v1285_v20, %v1176_v42 }
 0x3ac   :  { %vm1295_vm9 = vcmp.eq.s32.totalorder %v1293_v23, 1 }
 0x467   :  { %v1144_v36 = vpop.f32.mrf.mxu0 }
 0x468   :  { %v1145_v44 = vadd.f32 %v1144_v36, %v1105_v35 }
 0x469   :  { %v2475_v37 = vpop.f32.mrf.mxu0 }
 0x46a   :  { %v1157_v40 = vrot.slane %v1145_v44, %v1097_v33 }
 0x46b   :  { %v1147_v43 = vpop.f32.mrf.mxu0 }
 0x46c   :  { %v1158_v51 = vcombine.high %v1157_v40, %v1157_v40  ;;  %v1165_v53 = vrot.slane %v1157_v40, %v1097_v33 }
 0x46d   :  { %v2476_v57 = vpop.f32.mrf.mxu0 }
 0x46e   :  { %v1172_v62 = vrot.slane %v1158_v51, %v1097_v33  ;;  %v1177_v1 = vrot.slane %v1165_v53, %v1176_v42 }
 0x470   :  { %v1181_v3 = vrot.slane %v1172_v62, %v1176_v42  ;;  %v3142_v5 = vadd.f32 %v1177_v1, %v1173_v54 }
 0x472   :  { %v3144_v6 = vadd.f32 %v1181_v3, %v1173_v54  ;;  %v1188_v10 = vpack.c.bf16 %v3142_v5, %v3142_v5 }
 0x474   :  { %2480 = vmatmul.mubr.msk.bf16.vlgmr.msra.gmra.mxu1 %vm372_vm1, %v1188_v10  ;;  %v1189_v12 = vpack.c.bf16 %v3144_v6, %v3144_v6 }
 0x475   :  { %2490 = vmatpush3.bf16.msra.mxu1 %v3095_v39  ;;  %2491 = vmatprep.mubr.msk.bf16.mxu1 %vm2779_vm2, %v2778_v58  ;;  %v1284_v39 = vsel %vm1282_vm6, 1, %v2781_v19 }
 0x476   :  { %2486 = vmatmul.mubr.msk.bf16.vlgmr.msra.gmra.mxu0 %vm372_vm1, %v1189_v12  ;;  %2501 = vmatprep.subr.bf16.mxu1 %v2778_v58  ;;  %v1289_v22 = vrot.slane %v1284_v39, %v1176_v42 }
 0x477   :  { %2496 = vmatpush3.bf16.msra.mxu0 %v3101_v47  ;;  %2497 = vmatprep.mubr.msk.bf16.mxu0 %vm2779_vm2, %v2778_v58 }
 0x478   :  { %2513 = vmatprep.subr.bf16.mxu0 %v2778_v58  ;;  %vm1294_vm8 = vcmp.eq.s32.totalorder %v1289_v22, 1 }
 0x534   :  { %v1229_v25 = vpop.f32.mrf.mxu1 }
 0x535   :  { %v1280_v30 = vmul.f32 0.17677669, %v1229_v25 }
 0x536   :  { %v2481_v32 = vpop.f32.mrf.mxu1  ;;  %v1274_v33 = vpop.f32.mrf.mxu0 }
 0x537   :  { %v1281_v47 = vmul.f32 0.17677669, %v1274_v33  ;;  %v1296_v34 = vsel %vm1294_vm8, -1e+09, %v1280_v30  ;;  %v1425_v30 = vsel %vm372_vm1, %v3023_v18, 0 }
 0x538   :  { %v1232_v35 = vpop.f32.mrf.mxu1  ;;  %v2487_v36 = vpop.f32.mrf.mxu0  ;;  %v1298_v44 = vsel %vm969_vm4, %v1296_v34, -inf }
 0x539   :  { %1299 = vmax.xlane.f32.xlu0 %v1298_v44  ;;  %v1297_v37 = vsel %vm1295_vm9, -1e+09, %v1281_v47  ;;  %v1480_v47 = vsel %vm372_vm1, %v3031_v38, 0  ;;  %v1477_v35 = vsel %vm372_vm1, %v3033_v41, 0  ;;  %v1419_v36 = vsel %vm372_vm1, %v3019_v8, 0 }
 0x53a   :  { %v2482_v40 = vpop.f32.mrf.mxu1  ;;  %v1277_v43 = vpop.f32.mrf.mxu0  ;;  %v1301_v53 = vsel %vm969_vm4, %v1297_v37, -inf  ;;  %v1474_v44 = vsel %vm372_vm1, %v3027_v28, 0 }
 0x53b   :  { %v1471_v40 = vsel %vm372_vm1, %v3029_v31, 0 }
 0x53c   :  { %v2488_v51 = vpop.f32.mrf.mxu0 }
 0x53d   :  { %1302 = vmax.xlane.f32.xlu0 %v1301_v53 }
 0x5c2   :  { %v1300_v42 = vpop.xlane.xlu0 %1299 }
 0x5c3   :  { %v1304_v54 = vsub.f32 %v1296_v34, %v1300_v42  ;;  %v1422_v34 = vsel %vm372_vm1, %v3025_v21, 0 }
 0x5c5   :  { %v1306_v57 = vmul.f32 1.442695, %v1304_v54 }
 0x5c6   :  { %v1303_v62 = vpop.xlane.xlu0 %1302 }
 0x5c7   :  { %2686 = vpow2.f32 %v1306_v57  ;;  %v1305_v1 = vsub.f32 %v1297_v37, %v1303_v62  ;;  %v1416_v37 = vsel %vm372_vm1, %v3021_v11, 0 }
 0x5c9   :  { %v1308_v3 = vmul.f32 1.442695, %v1305_v1 }
 0x5cb   :  { %2688 = vpow2.f32 %v1308_v3 }
 0x5d4   :  { %v2687_v10 = vpop.eup %2686 }
 0x5d5   :  { %v1310_v12 = vsel %vm969_vm4, %v2687_v10, 0.0 }
 0x5d6   :  { %1311 = vadd.xlane.f32.xlu1 %v1310_v12 }
 0x5d8   :  { %v2689_v15 = vpop.eup %2688 }
 0x5d9   :  { %v1313_v16 = vsel %vm969_vm4, %v2689_v15, 0.0 }
 0x5da   :  { %1314 = vadd.xlane.f32.xlu1 %v1313_v16 }
 0x65f   :  { %v1312_v19 = vpop.xlane.xlu1 %1311 }
 0x660   :  { %2690 = vrcp.f32 %v1312_v19 }
 0x663   :  { %v1315_v39 = vpop.xlane.xlu1 %1314 }
 0x664   :  { %2692 = vrcp.f32 %v1315_v39 }
 0x66d   :  { %v2691_v20 = vpop.eup %2690 }
 0x66e   :  { %v1318_v22 = vmul.f32 %v2691_v20, %v2687_v10 }
 0x670   :  { %v1320_v23 = vpack.c.bf16 %v1318_v22, %v1318_v22 }
 0x671   :  { %v2693_v25 = vpop.eup %2692 }
 0x672   :  { %2492 = vmatmul.mubr.msk.bf16.vlgmr.msra.gmra.mxu1 %vm969_vm4, %v1320_v23  ;;  %v1319_v32 = vmul.f32 %v2693_v25, %v2689_v15 }
 0x673   :  { %2502 = vmatpush3.bf16.xpose.msra.mxu1 %v1425_v30  ;;  %2509 = vmatprep.mubr.msk.bf16.mxu1 %vm2779_vm2, %v2778_v58 }
 0x674   :  { %v1321_v33 = vpack.c.bf16 %v1319_v32, %v1319_v32  ;;  %2503 = vmatprep.subr.bf16.mxu1 %v2778_v58 }
 0x676   :  { %2498 = vmatmul.mubr.msk.bf16.vlgmr.msra.gmra.mxu0 %vm969_vm4, %v1321_v33 }
 0x677   :  { %2514 = vmatpush3.bf16.xpose.msra.mxu0 %v1480_v47  ;;  %2521 = vmatprep.mubr.msk.bf16.mxu0 %vm2779_vm2, %v2778_v58 }
 0x678   :  { %2515 = vmatprep.subr.bf16.mxu0 %v2778_v58 }
 0x67b   :  { %2504 = vmatpush3.bf16.xpose.msra.mxu1 %v1422_v34 }
 0x67c   :  { %2505 = vmatprep.subr.bf16.mxu1 %v2778_v58 }
 0x67f   :  { %2516 = vmatpush3.bf16.xpose.msra.mxu0 %v1477_v35 }
 0x680   :  { %2517 = vmatprep.subr.bf16.mxu0 %v2778_v58 }
 0x683   :  { %2506 = vmatpush3.bf16.xpose.msra.mxu1 %v1419_v36 }
 0x684   :  { %2507 = vmatprep.subr.bf16.mxu1 %v2778_v58 }
 0x687   :  { %2518 = vmatpush3.bf16.xpose.msra.mxu0 %v1474_v44 }
 0x688   :  { %2519 = vmatprep.subr.bf16.mxu0 %v2778_v58 }
 0x68b   :  { %2508 = vmatpush3.bf16.xpose.msra.mxu1 %v1416_v37 }
 0x68c   :  { %2525 = vmatprep.subr.bf16.mxu1 %v2778_v58 }
 0x68f   :  { %2520 = vmatpush3.bf16.xpose.msra.mxu0 %v1471_v40 }
 0x690   :  { %2537 = vmatprep.subr.bf16.mxu0 %v2778_v58 }
 0x732   :  { %v1359_v43 = vpop.f32.mrf.mxu1 }
 0x733   :  { %v3197_v51 = vadd.f32 %v1359_v43, %v3142_v5 }
 0x734   :  { %v2493_v53 = vpop.f32.mrf.mxu1 }
 0x735   :  { %v1410_v42 = vpack.c.bf16 %v3197_v51, %v3197_v51 }
 0x736   :  { %v1362_v54 = vpop.f32.mrf.mxu1  ;;  %v1402_v57 = vpop.f32.mrf.mxu0 }
 0x737   :  { %v3202_v62 = vadd.f32 %v1402_v57, %v3144_v6  ;;  %2510 = vmatmul.mubr.msk.bf16.vlgmr.msra.gmra.mxu1 %vm372_vm1, %v1410_v42  ;;  %v2676_v54 = vld [vmem:[%s3354_s8 + $0x8] sm:$0xff]   ;;  %v2677_v57 = vld [vmem:[%s3354_s8] sm:$0xff]  }
 0x738   :  { %2526 = vmatpush3.bf16.msra.mxu1 %v3023_v18  ;;  %v2494_v1 = vpop.f32.mrf.mxu1  ;;  %v2499_v3 = vpop.f32.mrf.mxu0  ;;  %2533 = vmatprep.mubr.msk.bf16.mxu1 %vm2779_vm2, %v2778_v58 }
 0x739   :  { %v1411_v5 = vpack.c.bf16 %v3202_v62, %v3202_v62  ;;  %2527 = vmatprep.subr.bf16.mxu1 %v2778_v58  ;;  %v2678_v1 = vld [vmem:[%s3355_s14 + $0x18] sm:$0xff]   ;;  %v2679_v3 = vld [vmem:[%s3355_s14 + $0x10] sm:$0xff]  }
 0x73a   :  { %v1405_v10 = vpop.f32.mrf.mxu0 }
 0x73b   :  { %2522 = vmatmul.mubr.msk.bf16.vlgmr.msra.gmra.mxu0 %vm372_vm1, %v1411_v5 }
 0x73c   :  { %2528 = vmatpush3.bf16.msra.mxu1 %v3025_v21  ;;  %2538 = vmatpush3.bf16.msra.mxu0 %v3031_v38  ;;  %v2500_v6 = vpop.f32.mrf.mxu0 }
 0x73d   :  { %2529 = vmatprep.subr.bf16.mxu1 %v2778_v58  ;;  %2539 = vmatprep.subr.bf16.mxu0 %v2778_v58 }
 0x73e   :  { %2545 = vmatprep.mubr.msk.bf16.mxu0 %vm2779_vm2, %v2778_v58 }
 0x740   :  { %2530 = vmatpush3.bf16.msra.mxu1 %v3019_v8  ;;  %2540 = vmatpush3.bf16.msra.mxu0 %v3033_v41 }
 0x741   :  { %2531 = vmatprep.subr.bf16.mxu1 %v2778_v58  ;;  %2541 = vmatprep.subr.bf16.mxu0 %v2778_v58 }
 0x744   :  { %2532 = vmatpush3.bf16.msra.mxu1 %v3021_v11  ;;  %2542 = vmatpush3.bf16.msra.mxu0 %v3027_v28 }
 0x745   :  { %2543 = vmatprep.subr.bf16.mxu0 %v2778_v58  ;;  %2549 = vmatprep.subr.bf16.mxu1 %v2778_v58 }
 0x748   :  { %2544 = vmatpush3.bf16.msra.mxu0 %v3029_v31 }
 0x749   :  { %2557 = vmatprep.subr.bf16.mxu0 %v2778_v58 }
 0x7f7   :  { %v1461_v18 = vpop.f32.mrf.mxu1 }
 0x7f8   :  { %v1522_v8 = vmul.f32 0.17677669, %v1461_v18 }
 0x7f9   :  { %v2511_v21 = vpop.f32.mrf.mxu1 }
 0x7fa   :  { %v1525_v38 = vsel %vm1524_vm10, %v1522_v8, -inf }
 0x7fb   :  { %v1516_v41 = vpop.f32.mrf.mxu0  ;;  %1526 = vmax.xlane.f32.xlu0 %v1525_v38  ;;  %v1464_v12 = vpop.f32.mrf.mxu1 }
 0x7fc   :  { %v1523_v11 = vmul.f32 0.17677669, %v1516_v41 }
 0x7fd   :  { %v2512_v15 = vpop.f32.mrf.mxu1  ;;  %v2523_v28 = vpop.f32.mrf.mxu0 }
 0x7fe   :  { %v1528_v16 = vsel %vm1524_vm10, %v1523_v11, -inf  ;;  %v2680_v28 = vld [vmem:[%s3355_s14 + $0x8] sm:$0xff]  }
 0x7ff   :  { %1529 = vmax.xlane.f32.xlu1 %v1528_v16  ;;  %v1519_v19 = vpop.f32.mrf.mxu0  ;;  %v2681_v16 = vld [vmem:[%s3355_s14] sm:$0xff]  }
 0x801   :  { %v2524_v39 = vpop.f32.mrf.mxu0 }
 0x884   :  { %v1527_v31 = vpop.xlane.xlu0 %1526 }
 0x885   :  { %v1531_v20 = vsub.f32 %v1522_v8, %v1527_v31 }
 0x887   :  { %v1533_v22 = vmul.f32 1.442695, %v1531_v20 }
 0x888   :  { %v1530_v23 = vpop.xlane.xlu1 %1529 }
 0x889   :  { %2694 = vpow2.f32 %v1533_v22  ;;  %v1532_v25 = vsub.f32 %v1523_v11, %v1530_v23 }
 0x88b   :  { %v1535_v30 = vmul.f32 1.442695, %v1532_v25 }
 0x88d   :  { %2696 = vpow2.f32 %v1535_v30 }
 0x896   :  { %v2695_v32 = vpop.eup %2694 }
 0x897   :  { %v1537_v33 = vsel %vm1524_vm10, %v2695_v32, 0.0 }
 0x898   :  { %1538 = vadd.xlane.f32.xlu0 %v1537_v33  ;;  %v1960_v33 = vsel %vm372_vm1, %v624_v63, 0 }
 0x89a   :  { %v2697_v47 = vpop.eup %2696 }
 0x89b   :  { %v1540_v34 = vsel %vm1524_vm10, %v2697_v47, 0.0 }
 0x89c   :  { %1541 = vadd.xlane.f32.xlu1 %v1540_v34  ;;  %v2684_v34 = vld [vmem:[%s3359_s12 + $0x8] sm:$0xff]  }
 0x921   :  { %v1539_v35 = vpop.xlane.xlu0 %1538 }
 0x922   :  { %2698 = vrcp.f32 %v1539_v35 }
 0x925   :  { %v1542_v36 = vpop.xlane.xlu1 %1541 }
 0x926   :  { %2700 = vrcp.f32 %v1542_v36  ;;  %v2685_v36 = vld [vmem:[%s3359_s12] sm:$0xff]  }
 0x92f   :  { %v2699_v44 = vpop.eup %2698 }
 0x930   :  { %v1545_v37 = vmul.f32 %v2699_v44, %v2695_v32  ;;  %v1963_v32 = vsel %vm372_vm1, %v625_v60, 0  ;;  %v2683_v60 = vld [vmem:[%s3357_s24] sm:$0xff]   ;;  %v2018_v44 = vsel %vm372_vm1, %v629_v26, 0 }
 0x932   :  { %v1547_v40 = vpack.c.bf16 %v1545_v37, %v1545_v37  ;;  %v2015_v37 = vsel %vm372_vm1, %v628_v29, 0 }
 0x933   :  { %v2701_v43 = vpop.eup %2700 }
 0x934   :  { %2534 = vmatmul.mubr.msk.bf16.vlgmr.msra.gmra.mxu1 %vm1524_vm10, %v1547_v40  ;;  %v1546_v53 = vmul.f32 %v2701_v43, %v2697_v47  ;;  %v2221_v43 = vld [vmem:[%s3361_s4] ss:$0 sm:$0xff] }
 0x935   :  { %2553 = vmatprep.mubr.msk.bf16.mxu1 %vm2779_vm2, %v2778_v58  ;;  %2550 = vmatpush3.bf16.msra.mxu1 %v2676_v54 }
 0x936   :  { %v1548_v42 = vpack.c.bf16 %v1546_v53, %v1546_v53  ;;  %2551 = vmatprep.subr.bf16.mxu1 %v2778_v58 }
 0x938   :  { %2546 = vmatmul.mubr.msk.bf16.vlgmr.msra.gmra.mxu0 %vm1524_vm10, %v1548_v42 }
 0x939   :  { %2565 = vmatprep.mubr.msk.bf16.mxu0 %vm2779_vm2, %v2778_v58  ;;  %2552 = vmatpush3.bf16.msra.mxu1 %v2677_v57 }
 0x93a   :  { %2569 = vmatprep.subr.bf16.mxu1 %v2778_v58  ;;  %2558 = vmatpush3.bf16.msra.mxu0 %v2678_v1 }
 0x93b   :  { %2559 = vmatprep.subr.bf16.mxu0 %v2778_v58 }
 0x93e   :  { %2560 = vmatpush3.bf16.msra.mxu0 %v2679_v3 }
 0x93f   :  { %2561 = vmatprep.subr.bf16.mxu0 %v2778_v58 }
 0x942   :  { %2562 = vmatpush3.bf16.msra.mxu0 %v2680_v28 }
 0x943   :  { %2563 = vmatprep.subr.bf16.mxu0 %v2778_v58 }
 0x946   :  { %2564 = vmatpush3.bf16.msra.mxu0 %v2681_v16 }
 0x947   :  { %2585 = vmatprep.subr.bf16.mxu0 %v2778_v58 }
 0x9f4   :  { %v1586_v5 = vpop.f32.mrf.mxu1 }
 0x9f5   :  { %v1635_v8 = vadd.f32 %v1586_v5, %v3197_v51  ;;  %v2204_v51 = vld [vmem:[%s3356_s19] ss:$0 sm:$0xff] }
 0x9f6   :  { %v2535_v10 = vpop.f32.mrf.mxu1 }
 0x9f8   :  { %v1589_v6 = vpop.f32.mrf.mxu1  ;;  %v1629_v18 = vpop.f32.mrf.mxu0 }
 0x9f9   :  { %v1636_v21 = vadd.f32 %v1629_v18, %v3202_v62 }
 0x9fa   :  { %v2536_v38 = vpop.f32.mrf.mxu1  ;;  %v2547_v41 = vpop.f32.mrf.mxu0 }
 0x9fb   :  { %v2227_v12 = vpack.c.bf16 %v1636_v21, %v1635_v8 }
 0x9fc   :  { %v1632_v11 = vpop.f32.mrf.mxu0 }
 0x9fd   :  { %2554 = vmatmul.mubr.msk.bf16.vlgmr.msra.gmra.mxu1 %vm372_vm1, %v2227_v12 }
 0x9fe   :  { %v2548_v15 = vpop.f32.mrf.mxu0  ;;  %2573 = vmatprep.mubr.msk.bf16.mxu1 %vm2779_vm2, %v2778_v58  ;;  %2570 = vmatpush3.bf16.msra.mxu1 %v2682_v59 }
 0x9ff   :  { %2571 = vmatprep.subr.bf16.mxu1 %v2778_v58 }
 0xa02   :  { %2572 = vmatpush3.bf16.msra.mxu1 %v2683_v60 }
 0xa03   :  { %2577 = vmatprep.subr.bf16.mxu1 %v2778_v58 }
 0xabd   :  { %v1704_v62 = vpop.f32.mrf.mxu1 }
 0xabe   :  { %v1705_v39 = vadd.f32 %v2204_v51, %v1704_v62 }
 0xabf   :  { %v2555_v19 = vpop.f32.mrf.mxu1 }
 0xac0   :  { %v1711_v23 = vmax.f32 %v1705_v39, 0.0 }
 0xac1   :  { %v1707_v31 = vpop.f32.mrf.mxu1 }
 0xac2   :  { %v1708_v20 = vadd.f32 %v2204_v51, %v1707_v31 }
 0xac3   :  { %v2556_v22 = vpop.f32.mrf.mxu1 }
 0xac4   :  { %v1712_v25 = vmax.f32 %v1708_v20, 0.0 }
 0xac6   :  { %v2228_v30 = vpack.c.bf16 %v1712_v25, %v1711_v23 }
 0xac8   :  { %2566 = vmatmul.mubr.msk.bf16.vlgmr.msra.gmra.mxu0 %vm1524_vm10, %v2228_v30 }
 0xac9   :  { %2586 = vmatpush3.bf16.xpose.msra.mxu0 %v1963_v32  ;;  %2593 = vmatprep.mubr.msk.bf16.mxu0 %vm2779_vm2, %v2778_v58 }
 0xaca   :  { %2587 = vmatprep.subr.bf16.mxu0 %v2778_v58 }
 0xad1   :  { %2588 = vmatpush3.bf16.xpose.msra.mxu0 %v1960_v33 }
 0xad2   :  { %2589 = vmatprep.subr.bf16.mxu0 %v2778_v58 }
 0xad9   :  { %2590 = vmatpush3.bf16.xpose.msra.mxu0 %v1957_v55 }
 0xada   :  { %2591 = vmatprep.subr.bf16.mxu0 %v2778_v58 }
 0xae1   :  { %2592 = vmatpush3.bf16.xpose.msra.mxu0 %v1954_v56 }
 0xb88   :  { %v1789_v45 = vpop.f32.mrf.mxu0 }
 0xb89   :  { %v1796_v49 = vadd.f32 %v1789_v45, %v1635_v8 }
 0xb8a   :  { %v2567_v46 = vpop.f32.mrf.mxu0 }
 0xb8b   :  { %v1805_v50 = vadd.f32 %v2215_v61, %v1796_v49 }
 0xb8c   :  { %v1792_v63 = vpop.f32.mrf.mxu0 }
 0xb8d   :  { %v1797_v47 = vadd.f32 %v1792_v63, %v1636_v21 }
 0xb8e   :  { %v2568_v48 = vpop.f32.mrf.mxu0 }
 0xb8f   :  { %v1806_v52 = vadd.f32 %v2215_v61, %v1797_v47 }
 0xb91   :  { %v2229_v35 = vpack.c.bf16 %v1806_v52, %v1805_v50 }
 0xb93   :  { %2574 = vmatmul.mubr.msk.bf16.vlgmr.msra.gmra.mxu1 %vm372_vm1, %v2229_v35 }
 0xb94   :  { %2578 = vmatpush3.bf16.msra.mxu1 %v2684_v34  ;;  %2581 = vmatprep.mubr.msk.bf16.mxu1 %vm2779_vm2, %v2778_v58 }
 0xb95   :  { %2579 = vmatprep.subr.bf16.mxu1 %v2778_v58 }
 0xb98   :  { %2580 = vmatpush3.bf16.msra.mxu1 %v2685_v36 }
 0xb99   :  { %2597 = vmatprep.subr.bf16.mxu1 %v2778_v58 }
 0xb9b   :  { %2582 = vmatmul.mubr.msk.bf16.vlgmr.msra.gmra.mxu1 %vm372_vm1, %v2229_v35 }
 0xb9c   :  { %2598 = vmatpush3.bf16.xpose.msra.mxu1 %v2018_v44  ;;  %2605 = vmatprep.mubr.msk.bf16.mxu1 %vm2779_vm2, %v2778_v58 }
 0xb9d   :  { %2599 = vmatprep.subr.bf16.mxu1 %v2778_v58 }
 0xba4   :  { %2600 = vmatpush3.bf16.xpose.msra.mxu1 %v2015_v37 }
 0xba5   :  { %2601 = vmatprep.subr.bf16.mxu1 %v2778_v58 }
 0xbac   :  { %2602 = vmatpush3.bf16.xpose.msra.mxu1 %v2012_v14 }
 0xbad   :  { %2603 = vmatprep.subr.bf16.mxu1 %v2778_v58 }
 0xbb4   :  { %2604 = vmatpush3.bf16.xpose.msra.mxu1 %v2009_v17 }
 0xc53   :  { %v1874_v26 = vpop.f32.mrf.mxu1 }
 0xc54   :  { %v1875_v27 = vadd.f32 %v2216_v24, %v1874_v26 }
 0xc55   :  { %v2575_v29 = vpop.f32.mrf.mxu1 }
 0xc56   :  { %1882 = vst.msk [vmem:[%s2939_s13] sm:$0xff] %vm1881_vm11, %v1875_v27 }
 0xc57   :  { %v1877_v40 = vpop.f32.mrf.mxu1 }
 0xc58   :  { %v1878_v0 = vadd.f32 %v2216_v24, %v1877_v40 }
 0xc59   :  { %v2576_v4 = vpop.f32.mrf.mxu1 }
 0xc5a   :  { %1883 = vst.msk [vmem:[%s2939_s13 + $0x8] sm:$0xff] %vm1881_vm11, %v1878_v0 }
 0xc5b   :  { %v1941_v7 = vpop.f32.mrf.mxu1 }
 0xc5c   :  { %v1942_v53 = vadd.f32 %v2221_v43, %v1941_v7 }
 0xc5d   :  { %v2583_v58 = vpop.f32.mrf.mxu1 }
 0xc5e   :  { %v1948_v42 = vpack.c.bf16 %v1942_v53, %v1942_v53 }
 0xc5f   :  { %v1944_v54 = vpop.f32.mrf.mxu1 }
 0xc60   :  { %v1945_v2 = vadd.f32 %v2221_v43, %v1944_v54  ;;  %2594 = vmatmul.mubr.msk.bf16.vlgmr.msra.gmra.mxu0 %vm372_vm1, %v1948_v42 }
 0xc61   :  { %v2584_v9 = vpop.f32.mrf.mxu1 }
 0xc62   :  { %v1949_v13 = vpack.c.bf16 %v1945_v2, %v1945_v2 }
 0xc64   :  { %2606 = vmatmul.mubr.msk.bf16.vlgmr.msra.gmra.mxu1 %vm372_vm1, %v1949_v13 }
 0xc65   :  { %2713 = shalt.err (!%p2710_p4)
}
 0xc66   :  { %s2784_s13 = smov 128   ;;  %s2785_s11 = smov 8  }
 0xc67   :  { %2077 = dma.vmem_to_hbm [thread:$0]  %s2072_s1, 512, %s2949_s20, [#allocation3], %s2784_s13, %s2784_s13, %s2785_s11  }
 0xc68   :  { %s2722_s15 = scalar_lea.vmem %s2085_s7, 128  ;;  %p2727_p6 = scmp.lt.s32.totalorder %s2085_s7, %s2085_s7 }
 0xc69   :  { %p2723_p5 = scmp.ne.s32.totalorder %s2085_s7, %s2722_s15  ;;  %p2728_p7 = scmp.lt.s32.totalorder %s2722_s15, %s2722_s15 }
 0xc6b   :  { %p2729_p8 = por %p2728_p7, %p2727_p6 }
 0xc6d   :  { %p2730_p9 = pnand %p2729_p8, %p2723_p5 }
 0xc6f   :  { %2733 = shalt.err (!%p2730_p9)
}
 0xc70   :  { %2087 = dma.vmem_to_hbm [thread:$0]  %s2085_s7, 128, %s2954_s30, [#allocation5]  }
 0xd20   :  { %v1999_v57 = vpop.f32.mrf.mxu0 }
 0xd21   :  { %2060 = vst.msk [vmem:[%s2944_s17] sm:$0xff] %vm1524_vm10, %v1999_v57 }
 0xd22   :  { %v2595_v1 = vpop.f32.mrf.mxu0 }
 0xd24   :  { %v2002_v3 = vpop.f32.mrf.mxu0  ;;  %v2054_v5 = vpop.f32.mrf.mxu1 }
 0xd25   :  { %2061 = vst.msk [vmem:[%s2944_s17 + $0x8] sm:$0xff] %vm1524_vm10, %v2054_v5 }
 0xd26   :  { %v2596_v10 = vpop.f32.mrf.mxu0  ;;  %v2607_v6 = vpop.f32.mrf.mxu1 }
 0xd28   :  { %v2057_v18 = vpop.f32.mrf.mxu1 }
 0xd2a   :  { %v2608_v8 = vpop.f32.mrf.mxu1 }
 0xd2b   :  { %2742 = dma.done.wait [#allocation3], 512  }
 0xd2c   :  { %2743 = vsyncadd [#allocation3], 4294966784 }
 0xd2d   :  { %2744 = dma.done.wait [#allocation5], 128  }
 0xd2e   :  { %2745 = vsyncadd [#allocation5], 4294967168 }
 0xd2f   :  { %2098 = vsyncpa [#allocation3], 1 }
 0xd30   :  { %2099 = vsyncpa [#allocation5], 1 }

</bundles_post_ra>
